<compile_context>
chip_gen: v7x
topology: tpu7x:2x2x1
jax: 0.10.0
libtpu: 0.0.40
codegen_flags: <defaults>
</compile_context>

<pallas_src>
import functools

import jax
import jax.numpy as jnp
from jax.experimental import pallas as pl
from jax.experimental.pallas import tpu as pltpu


def _round_up(x, m):
    return (x + m - 1) // m * m


# ----------------------------- Pallas kernel -------------------------------


def _make_attn_downsample_kernel(kernel_size, stride, coarse_w, lanes_out):
    """Builds the per-batch kernel with the static patch->(phase, shift) map baked in."""
    P = kernel_size * kernel_size

    def kernel(y_ref, mask_ref, lw_ref, wf_ref, bf_ref, lb_ref, out_ref):
        # y_ref:    (1, s*s, C, lanes_in)  space-to-depth padded hr_feats (one batch)
        # mask_ref: (1, 1, lanes_out)      dropout mask per output lane (0./1.)
        # lw_ref:   (C, lanes_out)         Linear(in_dim,1) weight, lane-dense
        # wf_ref:   (P,)  SMEM             per-patch-position scale (self.w)
        # bf_ref:   (P,)  SMEM             per-patch-position bias  (self.b)
        # lb_ref:   (1,)  SMEM             Linear(in_dim,1) bias (scalar)
        # out_ref:  (1, C, lanes_out)      lane-dense output slab
        lw = lw_ref[...]                       # (C, lanes_out), no broadcast needed
        mask = mask_ref[0]                     # (1, lanes_out)
        lb = lb_ref[0]                         # scalar

        def view(p):
            ki, kj = divmod(p, kernel_size)
            phase = (ki % stride) * stride + (kj % stride)
            shift = (ki // stride) * coarse_w + (kj // stride)
            return y_ref[0, phase, :, pl.ds(shift, lanes_out)].astype(jnp.float32)

        # ---- pass 1: per-patch-position attention logits (streamed over P) ----
        # Linear(in_dim, 1) stays on VPU + XLU sublane-reduce: a C=8..512
        # contraction would badly underuse the MXU (per review, keep non-MXU).
        rows = []
        for p in range(P):
            v = view(p)                                            # (C, lanes)
            logit = jnp.sum(v * lw, axis=0, keepdims=True) + lb    # (1, lanes)
            rows.append(logit * mask * wf_ref[p] + bf_ref[p])
        logits = jnp.concatenate(rows, axis=0)                     # (P, lanes)

        # ---- softmax over the patch dimension P ----
        m = jnp.max(logits, axis=0, keepdims=True)
        e = jnp.exp(logits - m)
        inv = pl.reciprocal(jnp.sum(e, axis=0, keepdims=True), approx=True)
        attn = e * inv                                             # (P, lanes)

        # ---- pass 2: attention-weighted patch sum, streamed FMA over P ----
        acc = jnp.zeros(out_ref.shape[1:], jnp.float32)            # (C, lanes)
        for p in range(P):
            acc = acc + view(p) * attn[p:p + 1, :]
        out_ref[0] = acc.astype(out_ref.dtype)

    return kernel


# ------------------------------ JAX wrapper ---------------------------------


@functools.partial(jax.jit, static_argnames=("kernel_size", "final_size"))
def attention_downsampler_forward(hr_feats, params, dropout_mask,
                                  kernel_size, final_size):
    B, C, H, W = hr_feats.shape
    s = H // final_size                                   # stride
    padding = max(0, (kernel_size - s + 1) // 2)
    H_out = (H + 2 * padding - kernel_size) // s + 1
    W_out = (W + 2 * padding - kernel_size) // s + 1
    P = kernel_size * kernel_size
    d = -(-kernel_size // s)                              # ceil(k / s) coarse offsets

    Hc, Wc = H_out + d - 1, W_out + d - 1                 # coarse grid incl. halo
    lanes_valid = Hc * Wc                                 # valid output lanes / batch
    lanes_out = _round_up(lanes_valid, 128)               # 128-mult -> unmasked vst
    halo = (d - 1) * (Wc + 1)                             # max in-kernel lane shift
    lanes_in = lanes_out + (_round_up(halo, 128) if halo else 0)

    # ---- space-to-depth relayout: single ~1x HBM pass, replaces 4x im2col ----
    xp = jnp.pad(hr_feats,
                 ((0, 0), (0, 0), (padding, padding), (padding, padding)))
    xp = jnp.pad(xp, ((0, 0), (0, 0),
                      (0, max(0, s * Hc - xp.shape[2])),
                      (0, max(0, s * Wc - xp.shape[3]))))
    xp = xp[:, :, :s * Hc, :s * Wc]                       # (B, C, s*Hc, s*Wc)
    y = xp.reshape(B, C, Hc, s, Wc, s)
    y = jnp.transpose(y, (0, 3, 5, 1, 2, 4))              # (B, ri, rj, C, Hc, Wc)
    y = y.reshape(B, s * s, C, lanes_valid)
    y = jnp.pad(y, ((0, 0), (0, 0), (0, 0), (0, lanes_in - lanes_valid)))

    # VMEM sanity: double-buffered per-batch slab must fit comfortably in the
    # default scoped VMEM on every generation (v5e 16 MiB, v6e/v7x 32 MiB).
    y_block_bytes = s * s * C * lanes_in * y.dtype.itemsize
    assert y_block_bytes <= 6 * 1024 * 1024, (
        "per-batch slab too large for whole-batch blocking; tile lanes/C "
        f"with a halo'd manual DMA instead ({y_block_bytes} bytes)")

    # ---- small operands: lane-dense weight, lane-dense mask, SMEM scalars ----
    mask_c = jnp.zeros((B, Hc, Wc), jnp.float32)
    mask_c = mask_c.at[:, :H_out, :W_out].set(
        dropout_mask.reshape(B, H_out, W_out).astype(jnp.float32))
    mask_c = mask_c.reshape(B, 1, lanes_valid)
    mask_c = jnp.pad(mask_c, ((0, 0), (0, 0), (0, lanes_out - lanes_valid)))

    lw = jnp.broadcast_to(params["lin_w"].reshape(C, 1).astype(jnp.float32),
                          (C, lanes_out))                 # lane-dense Linear weight
    lb = params["lin_b"].reshape(1).astype(jnp.float32)   # SMEM scalar
    wf = params["w"].reshape(P).astype(jnp.float32)       # SMEM, row-major (ki,kj)
    bf = params["b"].reshape(P).astype(jnp.float32)

    kern = _make_attn_downsample_kernel(kernel_size, s, Wc, lanes_out)

    out = pl.pallas_call(
        kern,
        out_shape=jax.ShapeDtypeStruct((B, C, lanes_out), jnp.float32),
        grid_spec=pltpu.PrefetchScalarGridSpec(
            num_scalar_prefetch=0,
            grid=(B,),
            in_specs=[
                pl.BlockSpec((1, s * s, C, lanes_in), lambda b: (b, 0, 0, 0)),
                pl.BlockSpec((1, 1, lanes_out), lambda b: (b, 0, 0)),
                pl.BlockSpec((C, lanes_out), lambda b: (0, 0)),
                pl.BlockSpec(memory_space=pltpu.MemorySpace.SMEM),
                pl.BlockSpec(memory_space=pltpu.MemorySpace.SMEM),
                pl.BlockSpec(memory_space=pltpu.MemorySpace.SMEM),
            ],
            out_specs=pl.BlockSpec((1, C, lanes_out), lambda b: (b, 0, 0)),
        ),
        compiler_params=pltpu.CompilerParams(
            dimension_semantics=("parallel",)),
    )(y, mask_c, lw, wf, bf, lb)

    # Strip pad lanes / halo columns back to NCHW.
    out = out[:, :, :lanes_valid].reshape(B, C, Hc, Wc)[:, :, :H_out, :W_out]
    return out[:, :C, :, :]


# -------- Plain-JAX reference (independent unfold layout) for correctness ---


def _unfold_patches_ref(hr_feats, kernel_size, final_size):
    B, C, H, W = hr_feats.shape
    stride = H // final_size
    padding = max(0, (kernel_size - stride + 1) // 2)
    H_out = (H + 2 * padding - kernel_size) // stride + 1
    W_out = (W + 2 * padding - kernel_size) // stride + 1
    x = jnp.pad(hr_feats,
                ((0, 0), (0, 0), (padding, padding), (padding, padding)))
    slabs = []
    for ki in range(kernel_size):
        for kj in range(kernel_size):
            slabs.append(x[:, :,
                           ki:ki + stride * H_out:stride,
                           kj:kj + stride * W_out:stride])
    patches = jnp.stack(slabs, axis=2)                    # (B, C, P, H_out, W_out)
    patches = jnp.transpose(patches, (0, 3, 4, 2, 1))     # (B, H_out, W_out, P, C)
    P = kernel_size * kernel_size
    return patches.reshape(B, H_out * W_out, P, C), H_out, W_out


def _reference_forward(hr_feats, params, dropout_mask, kernel_size, final_size):
    B, C, H, W = hr_feats.shape
    patches, H_out, W_out = _unfold_patches_ref(hr_feats.astype(jnp.float32),
                                                kernel_size, final_size)
    N = H_out * W_out
    P = kernel_size * kernel_size
    lw = params["lin_w"].reshape(C, 1)
    lb = params["lin_b"].reshape(1, 1, 1)
    logits = jnp.einsum("bnpc,co->bnpo", patches, lw)[..., 0] + lb
    mask = dropout_mask.reshape(B, N, 1).astype(jnp.float32)
    attn_logits = logits * mask * params["w"].reshape(1, 1, P) \
        + params["b"].reshape(1, 1, P)
    attn = jax.nn.softmax(attn_logits, axis=-1)
    out = jnp.einsum("bnpc,bnp->bnc", patches, attn)
    out = out.reshape(B, H_out, W_out, C)
    return jnp.transpose(out, (0, 3, 1, 2))[:, :C, :, :]


# ---------------------------------- main ------------------------------------


if __name__ == "__main__":
    # Module config (blur_attn=False): dim=8, kernel_size=4, final_size=8.
    dim = 8
    kernel_size = 4
    final_size = 8
    B, H, W = 2, 16, 16

    key = jax.random.PRNGKey(0)
    k_feat, k_w, k_b, k_lw, k_lb, k_drop = jax.random.split(key, 6)

    hr_feats = jax.random.normal(k_feat, (B, dim, H, W), dtype=jnp.float32)

    params = {
        # self.w = ones(k,k) + 0.01*randn;  self.b = zeros(k,k) + 0.01*randn
        "w": jnp.ones((kernel_size, kernel_size), jnp.float32)
             + 0.01 * jax.random.normal(k_w, (kernel_size, kernel_size)),
        "b": jnp.zeros((kernel_size, kernel_size), jnp.float32)
             + 0.01 * jax.random.normal(k_b, (kernel_size, kernel_size)),
        # attention_net Linear(in_dim, 1): weight (1, in_dim), bias (1,)
        "lin_w": 0.1 * jax.random.normal(k_lw, (1, dim), dtype=jnp.float32),
        "lin_b": 0.1 * jax.random.normal(k_lb, (1,), dtype=jnp.float32),
    }

    # forward()'s explicit dropout mask: torch.rand(b, h, w, 1) > 0.2
    W_out = (final_size * W) // H
    dropout_mask = (jax.random.uniform(k_drop, (B, final_size, W_out, 1)) > 0.2)

    out = attention_downsampler_forward(hr_feats, params, dropout_mask,
                                        kernel_size, final_size)
    out = jax.block_until_ready(out)

    ref = _reference_forward(hr_feats, params, dropout_mask,
                             kernel_size, final_size)
    assert out.shape == (B, dim, final_size, W_out), out.shape
    # Tolerance relaxed vs 1e-5 because the softmax denominator uses the EUP
    # approximate reciprocal (pl.reciprocal(approx=True), ~1e-4 rel error).
    assert jnp.allclose(out, ref, atol=2e-3, rtol=2e-3), \
        float(jnp.max(jnp.abs(out - ref)))

    print("KERNEL_OK")
</pallas_src>

<mosaic_0001>
module attributes {stable_mosaic.version = 11 : i64} {
  func.func @kernel(%arg0: i32, %arg1: memref<1x4x8x256xf32, #tpu.memory_space<vmem>>, %arg2: memref<1x1x128xf32, #tpu.memory_space<vmem>>, %arg3: memref<8x128xf32, #tpu.memory_space<vmem>>, %arg4: memref<16xf32, #tpu.memory_space<smem>>, %arg5: memref<16xf32, #tpu.memory_space<smem>>, %arg6: memref<1xf32, #tpu.memory_space<smem>>, %arg7: memref<1x8x128xf32, #tpu.memory_space<vmem>>) attributes {dimension_semantics = [#tpu.dimension_semantics<parallel>], iteration_bounds = array<i64: 2>, scalar_prefetch = 0 : i64, scratch_operands = 0 : i64, tpu.core_type = #tpu.core_type<tc>, window_params = [{transform_indices = @transform_0, window_bounds = array<i64: 1, 4, 8, 256>}, {transform_indices = @transform_1, window_bounds = array<i64: 1, 1, 128>}, {pipeline_mode = #tpu.pipeline_mode<synchronous>, transform_indices = @transform_2, window_bounds = array<i64: 8, 128>}, {transform_indices = @transform_3, window_bounds = array<i64: 16>}, {transform_indices = @transform_4, window_bounds = array<i64: 16>}, {transform_indices = @transform_5, window_bounds = array<i64: 1>}, {transform_indices = @transform_6, window_bounds = array<i64: 1, 8, 128>}]} {
    %c0 = arith.constant 0 : index
    %c0_0 = arith.constant 0 : index
    %0 = vector.load %arg3[%c0, %c0_0] : memref<8x128xf32, #tpu.memory_space<vmem>>, vector<8x128xf32>
    %c0_1 = arith.constant 0 : index
    %c0_2 = arith.constant 0 : index
    %c0_3 = arith.constant 0 : index
    %1 = vector.load %arg2[%c0_1, %c0_2, %c0_3] : memref<1x1x128xf32, #tpu.memory_space<vmem>>, vector<1x1x128xf32>
    %2 = vector.shape_cast %1 : vector<1x1x128xf32> to vector<1x128xf32>
    %c0_4 = arith.constant 0 : index
    %3 = memref.load %arg6[%c0_4] : memref<1xf32, #tpu.memory_space<smem>>
    %c0_5 = arith.constant 0 : index
    %c0_6 = arith.constant 0 : index
    %c0_7 = arith.constant 0 : index
    %c0_8 = arith.constant 0 : index
    %4 = vector.load %arg1[%c0_5, %c0_6, %c0_7, %c0_8] : memref<1x4x8x256xf32, #tpu.memory_space<vmem>>, vector<1x1x8x128xf32>
    %5 = vector.shape_cast %4 : vector<1x1x8x128xf32> to vector<8x128xf32>
    %6 = arith.mulf %5, %0 : vector<8x128xf32>
    %cst = arith.constant dense<0.000000e+00> : vector<128xf32>
    %7 = vector.multi_reduction <add>, %6, %cst [0] : vector<8x128xf32> to vector<128xf32>
    %8 = vector.shape_cast %7 : vector<128xf32> to vector<1x128xf32>
    %9 = vector.broadcast %3 : f32 to vector<1x128xf32>
    %10 = arith.addf %8, %9 : vector<1x128xf32>
    %11 = arith.mulf %10, %2 : vector<1x128xf32>
    %c0_9 = arith.constant 0 : index
    %12 = memref.load %arg4[%c0_9] : memref<16xf32, #tpu.memory_space<smem>>
    %13 = vector.broadcast %12 : f32 to vector<1x128xf32>
    %14 = arith.mulf %11, %13 : vector<1x128xf32>
    %c0_10 = arith.constant 0 : index
    %15 = memref.load %arg5[%c0_10] : memref<16xf32, #tpu.memory_space<smem>>
    %16 = vector.broadcast %15 : f32 to vector<1x128xf32>
    %17 = arith.addf %14, %16 : vector<1x128xf32>
    %c0_11 = arith.constant 0 : index
    %c1 = arith.constant 1 : index
    %c0_12 = arith.constant 0 : index
    %c0_13 = arith.constant 0 : index
    %18 = vector.load %arg1[%c0_11, %c1, %c0_12, %c0_13] : memref<1x4x8x256xf32, #tpu.memory_space<vmem>>, vector<1x1x8x128xf32>
    %19 = vector.shape_cast %18 : vector<1x1x8x128xf32> to vector<8x128xf32>
    %20 = arith.mulf %19, %0 : vector<8x128xf32>
    %cst_14 = arith.constant dense<0.000000e+00> : vector<128xf32>
    %21 = vector.multi_reduction <add>, %20, %cst_14 [0] : vector<8x128xf32> to vector<128xf32>
    %22 = vector.shape_cast %21 : vector<128xf32> to vector<1x128xf32>
    %23 = vector.broadcast %3 : f32 to vector<1x128xf32>
    %24 = arith.addf %22, %23 : vector<1x128xf32>
    %25 = arith.mulf %24, %2 : vector<1x128xf32>
    %c1_15 = arith.constant 1 : index
    %26 = memref.load %arg4[%c1_15] : memref<16xf32, #tpu.memory_space<smem>>
    %27 = vector.broadcast %26 : f32 to vector<1x128xf32>
    %28 = arith.mulf %25, %27 : vector<1x128xf32>
    %c1_16 = arith.constant 1 : index
    %29 = memref.load %arg5[%c1_16] : memref<16xf32, #tpu.memory_space<smem>>
    %30 = vector.broadcast %29 : f32 to vector<1x128xf32>
    %31 = arith.addf %28, %30 : vector<1x128xf32>
    %c0_17 = arith.constant 0 : index
    %c0_18 = arith.constant 0 : index
    %c0_19 = arith.constant 0 : index
    %c1_20 = arith.constant 1 : index
    %32 = vector.load %arg1[%c0_17, %c0_18, %c0_19, %c1_20] : memref<1x4x8x256xf32, #tpu.memory_space<vmem>>, vector<1x1x8x128xf32>
    %33 = vector.shape_cast %32 : vector<1x1x8x128xf32> to vector<8x128xf32>
    %34 = arith.mulf %33, %0 : vector<8x128xf32>
    %cst_21 = arith.constant dense<0.000000e+00> : vector<128xf32>
    %35 = vector.multi_reduction <add>, %34, %cst_21 [0] : vector<8x128xf32> to vector<128xf32>
    %36 = vector.shape_cast %35 : vector<128xf32> to vector<1x128xf32>
    %37 = vector.broadcast %3 : f32 to vector<1x128xf32>
    %38 = arith.addf %36, %37 : vector<1x128xf32>
    %39 = arith.mulf %38, %2 : vector<1x128xf32>
    %c2 = arith.constant 2 : index
    %40 = memref.load %arg4[%c2] : memref<16xf32, #tpu.memory_space<smem>>
    %41 = vector.broadcast %40 : f32 to vector<1x128xf32>
    %42 = arith.mulf %39, %41 : vector<1x128xf32>
    %c2_22 = arith.constant 2 : index
    %43 = memref.load %arg5[%c2_22] : memref<16xf32, #tpu.memory_space<smem>>
    %44 = vector.broadcast %43 : f32 to vector<1x128xf32>
    %45 = arith.addf %42, %44 : vector<1x128xf32>
    %c0_23 = arith.constant 0 : index
    %c1_24 = arith.constant 1 : index
    %c0_25 = arith.constant 0 : index
    %c1_26 = arith.constant 1 : index
    %46 = vector.load %arg1[%c0_23, %c1_24, %c0_25, %c1_26] : memref<1x4x8x256xf32, #tpu.memory_space<vmem>>, vector<1x1x8x128xf32>
    %47 = vector.shape_cast %46 : vector<1x1x8x128xf32> to vector<8x128xf32>
    %48 = arith.mulf %47, %0 : vector<8x128xf32>
    %cst_27 = arith.constant dense<0.000000e+00> : vector<128xf32>
    %49 = vector.multi_reduction <add>, %48, %cst_27 [0] : vector<8x128xf32> to vector<128xf32>
    %50 = vector.shape_cast %49 : vector<128xf32> to vector<1x128xf32>
    %51 = vector.broadcast %3 : f32 to vector<1x128xf32>
    %52 = arith.addf %50, %51 : vector<1x128xf32>
    %53 = arith.mulf %52, %2 : vector<1x128xf32>
    %c3 = arith.constant 3 : index
    %54 = memref.load %arg4[%c3] : memref<16xf32, #tpu.memory_space<smem>>
    %55 = vector.broadcast %54 : f32 to vector<1x128xf32>
    %56 = arith.mulf %53, %55 : vector<1x128xf32>
    %c3_28 = arith.constant 3 : index
    %57 = memref.load %arg5[%c3_28] : memref<16xf32, #tpu.memory_space<smem>>
    %58 = vector.broadcast %57 : f32 to vector<1x128xf32>
    %59 = arith.addf %56, %58 : vector<1x128xf32>
    %c0_29 = arith.constant 0 : index
    %c2_30 = arith.constant 2 : index
    %c0_31 = arith.constant 0 : index
    %c0_32 = arith.constant 0 : index
    %60 = vector.load %arg1[%c0_29, %c2_30, %c0_31, %c0_32] : memref<1x4x8x256xf32, #tpu.memory_space<vmem>>, vector<1x1x8x128xf32>
    %61 = vector.shape_cast %60 : vector<1x1x8x128xf32> to vector<8x128xf32>
    %62 = arith.mulf %61, %0 : vector<8x128xf32>
    %cst_33 = arith.constant dense<0.000000e+00> : vector<128xf32>
    %63 = vector.multi_reduction <add>, %62, %cst_33 [0] : vector<8x128xf32> to vector<128xf32>
    %64 = vector.shape_cast %63 : vector<128xf32> to vector<1x128xf32>
    %65 = vector.broadcast %3 : f32 to vector<1x128xf32>
    %66 = arith.addf %64, %65 : vector<1x128xf32>
    %67 = arith.mulf %66, %2 : vector<1x128xf32>
    %c4 = arith.constant 4 : index
    %68 = memref.load %arg4[%c4] : memref<16xf32, #tpu.memory_space<smem>>
    %69 = vector.broadcast %68 : f32 to vector<1x128xf32>
    %70 = arith.mulf %67, %69 : vector<1x128xf32>
    %c4_34 = arith.constant 4 : index
    %71 = memref.load %arg5[%c4_34] : memref<16xf32, #tpu.memory_space<smem>>
    %72 = vector.broadcast %71 : f32 to vector<1x128xf32>
    %73 = arith.addf %70, %72 : vector<1x128xf32>
    %c0_35 = arith.constant 0 : index
    %c3_36 = arith.constant 3 : index
    %c0_37 = arith.constant 0 : index
    %c0_38 = arith.constant 0 : index
    %74 = vector.load %arg1[%c0_35, %c3_36, %c0_37, %c0_38] : memref<1x4x8x256xf32, #tpu.memory_space<vmem>>, vector<1x1x8x128xf32>
    %75 = vector.shape_cast %74 : vector<1x1x8x128xf32> to vector<8x128xf32>
    %76 = arith.mulf %75, %0 : vector<8x128xf32>
    %cst_39 = arith.constant dense<0.000000e+00> : vector<128xf32>
    %77 = vector.multi_reduction <add>, %76, %cst_39 [0] : vector<8x128xf32> to vector<128xf32>
    %78 = vector.shape_cast %77 : vector<128xf32> to vector<1x128xf32>
    %79 = vector.broadcast %3 : f32 to vector<1x128xf32>
    %80 = arith.addf %78, %79 : vector<1x128xf32>
    %81 = arith.mulf %80, %2 : vector<1x128xf32>
    %c5 = arith.constant 5 : index
    %82 = memref.load %arg4[%c5] : memref<16xf32, #tpu.memory_space<smem>>
    %83 = vector.broadcast %82 : f32 to vector<1x128xf32>
    %84 = arith.mulf %81, %83 : vector<1x128xf32>
    %c5_40 = arith.constant 5 : index
    %85 = memref.load %arg5[%c5_40] : memref<16xf32, #tpu.memory_space<smem>>
    %86 = vector.broadcast %85 : f32 to vector<1x128xf32>
    %87 = arith.addf %84, %86 : vector<1x128xf32>
    %c0_41 = arith.constant 0 : index
    %c2_42 = arith.constant 2 : index
    %c0_43 = arith.constant 0 : index
    %c1_44 = arith.constant 1 : index
    %88 = vector.load %arg1[%c0_41, %c2_42, %c0_43, %c1_44] : memref<1x4x8x256xf32, #tpu.memory_space<vmem>>, vector<1x1x8x128xf32>
    %89 = vector.shape_cast %88 : vector<1x1x8x128xf32> to vector<8x128xf32>
    %90 = arith.mulf %89, %0 : vector<8x128xf32>
    %cst_45 = arith.constant dense<0.000000e+00> : vector<128xf32>
    %91 = vector.multi_reduction <add>, %90, %cst_45 [0] : vector<8x128xf32> to vector<128xf32>
    %92 = vector.shape_cast %91 : vector<128xf32> to vector<1x128xf32>
    %93 = vector.broadcast %3 : f32 to vector<1x128xf32>
    %94 = arith.addf %92, %93 : vector<1x128xf32>
    %95 = arith.mulf %94, %2 : vector<1x128xf32>
    %c6 = arith.constant 6 : index
    %96 = memref.load %arg4[%c6] : memref<16xf32, #tpu.memory_space<smem>>
    %97 = vector.broadcast %96 : f32 to vector<1x128xf32>
    %98 = arith.mulf %95, %97 : vector<1x128xf32>
    %c6_46 = arith.constant 6 : index
    %99 = memref.load %arg5[%c6_46] : memref<16xf32, #tpu.memory_space<smem>>
    %100 = vector.broadcast %99 : f32 to vector<1x128xf32>
    %101 = arith.addf %98, %100 : vector<1x128xf32>
    %c0_47 = arith.constant 0 : index
    %c3_48 = arith.constant 3 : index
    %c0_49 = arith.constant 0 : index
    %c1_50 = arith.constant 1 : index
    %102 = vector.load %arg1[%c0_47, %c3_48, %c0_49, %c1_50] : memref<1x4x8x256xf32, #tpu.memory_space<vmem>>, vector<1x1x8x128xf32>
    %103 = vector.shape_cast %102 : vector<1x1x8x128xf32> to vector<8x128xf32>
    %104 = arith.mulf %103, %0 : vector<8x128xf32>
    %cst_51 = arith.constant dense<0.000000e+00> : vector<128xf32>
    %105 = vector.multi_reduction <add>, %104, %cst_51 [0] : vector<8x128xf32> to vector<128xf32>
    %106 = vector.shape_cast %105 : vector<128xf32> to vector<1x128xf32>
    %107 = vector.broadcast %3 : f32 to vector<1x128xf32>
    %108 = arith.addf %106, %107 : vector<1x128xf32>
    %109 = arith.mulf %108, %2 : vector<1x128xf32>
    %c7 = arith.constant 7 : index
    %110 = memref.load %arg4[%c7] : memref<16xf32, #tpu.memory_space<smem>>
    %111 = vector.broadcast %110 : f32 to vector<1x128xf32>
    %112 = arith.mulf %109, %111 : vector<1x128xf32>
    %c7_52 = arith.constant 7 : index
    %113 = memref.load %arg5[%c7_52] : memref<16xf32, #tpu.memory_space<smem>>
    %114 = vector.broadcast %113 : f32 to vector<1x128xf32>
    %115 = arith.addf %112, %114 : vector<1x128xf32>
    %c0_53 = arith.constant 0 : index
    %c0_54 = arith.constant 0 : index
    %c0_55 = arith.constant 0 : index
    %c9 = arith.constant 9 : index
    %116 = vector.load %arg1[%c0_53, %c0_54, %c0_55, %c9] : memref<1x4x8x256xf32, #tpu.memory_space<vmem>>, vector<1x1x8x128xf32>
    %117 = vector.shape_cast %116 : vector<1x1x8x128xf32> to vector<8x128xf32>
    %118 = arith.mulf %117, %0 : vector<8x128xf32>
    %cst_56 = arith.constant dense<0.000000e+00> : vector<128xf32>
    %119 = vector.multi_reduction <add>, %118, %cst_56 [0] : vector<8x128xf32> to vector<128xf32>
    %120 = vector.shape_cast %119 : vector<128xf32> to vector<1x128xf32>
    %121 = vector.broadcast %3 : f32 to vector<1x128xf32>
    %122 = arith.addf %120, %121 : vector<1x128xf32>
    %123 = arith.mulf %122, %2 : vector<1x128xf32>
    %c8 = arith.constant 8 : index
    %124 = memref.load %arg4[%c8] : memref<16xf32, #tpu.memory_space<smem>>
    %125 = vector.broadcast %124 : f32 to vector<1x128xf32>
    %126 = arith.mulf %123, %125 : vector<1x128xf32>
    %c8_57 = arith.constant 8 : index
    %127 = memref.load %arg5[%c8_57] : memref<16xf32, #tpu.memory_space<smem>>
    %128 = vector.broadcast %127 : f32 to vector<1x128xf32>
    %129 = arith.addf %126, %128 : vector<1x128xf32>
    %c0_58 = arith.constant 0 : index
    %c1_59 = arith.constant 1 : index
    %c0_60 = arith.constant 0 : index
    %c9_61 = arith.constant 9 : index
    %130 = vector.load %arg1[%c0_58, %c1_59, %c0_60, %c9_61] : memref<1x4x8x256xf32, #tpu.memory_space<vmem>>, vector<1x1x8x128xf32>
    %131 = vector.shape_cast %130 : vector<1x1x8x128xf32> to vector<8x128xf32>
    %132 = arith.mulf %131, %0 : vector<8x128xf32>
    %cst_62 = arith.constant dense<0.000000e+00> : vector<128xf32>
    %133 = vector.multi_reduction <add>, %132, %cst_62 [0] : vector<8x128xf32> to vector<128xf32>
    %134 = vector.shape_cast %133 : vector<128xf32> to vector<1x128xf32>
    %135 = vector.broadcast %3 : f32 to vector<1x128xf32>
    %136 = arith.addf %134, %135 : vector<1x128xf32>
    %137 = arith.mulf %136, %2 : vector<1x128xf32>
    %c9_63 = arith.constant 9 : index
    %138 = memref.load %arg4[%c9_63] : memref<16xf32, #tpu.memory_space<smem>>
    %139 = vector.broadcast %138 : f32 to vector<1x128xf32>
    %140 = arith.mulf %137, %139 : vector<1x128xf32>
    %c9_64 = arith.constant 9 : index
    %141 = memref.load %arg5[%c9_64] : memref<16xf32, #tpu.memory_space<smem>>
    %142 = vector.broadcast %141 : f32 to vector<1x128xf32>
    %143 = arith.addf %140, %142 : vector<1x128xf32>
    %c0_65 = arith.constant 0 : index
    %c0_66 = arith.constant 0 : index
    %c0_67 = arith.constant 0 : index
    %c10 = arith.constant 10 : index
    %144 = vector.load %arg1[%c0_65, %c0_66, %c0_67, %c10] : memref<1x4x8x256xf32, #tpu.memory_space<vmem>>, vector<1x1x8x128xf32>
    %145 = vector.shape_cast %144 : vector<1x1x8x128xf32> to vector<8x128xf32>
    %146 = arith.mulf %145, %0 : vector<8x128xf32>
    %cst_68 = arith.constant dense<0.000000e+00> : vector<128xf32>
    %147 = vector.multi_reduction <add>, %146, %cst_68 [0] : vector<8x128xf32> to vector<128xf32>
    %148 = vector.shape_cast %147 : vector<128xf32> to vector<1x128xf32>
    %149 = vector.broadcast %3 : f32 to vector<1x128xf32>
    %150 = arith.addf %148, %149 : vector<1x128xf32>
    %151 = arith.mulf %150, %2 : vector<1x128xf32>
    %c10_69 = arith.constant 10 : index
    %152 = memref.load %arg4[%c10_69] : memref<16xf32, #tpu.memory_space<smem>>
    %153 = vector.broadcast %152 : f32 to vector<1x128xf32>
    %154 = arith.mulf %151, %153 : vector<1x128xf32>
    %c10_70 = arith.constant 10 : index
    %155 = memref.load %arg5[%c10_70] : memref<16xf32, #tpu.memory_space<smem>>
    %156 = vector.broadcast %155 : f32 to vector<1x128xf32>
    %157 = arith.addf %154, %156 : vector<1x128xf32>
    %c0_71 = arith.constant 0 : index
    %c1_72 = arith.constant 1 : index
    %c0_73 = arith.constant 0 : index
    %c10_74 = arith.constant 10 : index
    %158 = vector.load %arg1[%c0_71, %c1_72, %c0_73, %c10_74] : memref<1x4x8x256xf32, #tpu.memory_space<vmem>>, vector<1x1x8x128xf32>
    %159 = vector.shape_cast %158 : vector<1x1x8x128xf32> to vector<8x128xf32>
    %160 = arith.mulf %159, %0 : vector<8x128xf32>
    %cst_75 = arith.constant dense<0.000000e+00> : vector<128xf32>
    %161 = vector.multi_reduction <add>, %160, %cst_75 [0] : vector<8x128xf32> to vector<128xf32>
    %162 = vector.shape_cast %161 : vector<128xf32> to vector<1x128xf32>
    %163 = vector.broadcast %3 : f32 to vector<1x128xf32>
    %164 = arith.addf %162, %163 : vector<1x128xf32>
    %165 = arith.mulf %164, %2 : vector<1x128xf32>
    %c11 = arith.constant 11 : index
    %166 = memref.load %arg4[%c11] : memref<16xf32, #tpu.memory_space<smem>>
    %167 = vector.broadcast %166 : f32 to vector<1x128xf32>
    %168 = arith.mulf %165, %167 : vector<1x128xf32>
    %c11_76 = arith.constant 11 : index
    %169 = memref.load %arg5[%c11_76] : memref<16xf32, #tpu.memory_space<smem>>
    %170 = vector.broadcast %169 : f32 to vector<1x128xf32>
    %171 = arith.addf %168, %170 : vector<1x128xf32>
    %c0_77 = arith.constant 0 : index
    %c2_78 = arith.constant 2 : index
    %c0_79 = arith.constant 0 : index
    %c9_80 = arith.constant 9 : index
    %172 = vector.load %arg1[%c0_77, %c2_78, %c0_79, %c9_80] : memref<1x4x8x256xf32, #tpu.memory_space<vmem>>, vector<1x1x8x128xf32>
    %173 = vector.shape_cast %172 : vector<1x1x8x128xf32> to vector<8x128xf32>
    %174 = arith.mulf %173, %0 : vector<8x128xf32>
    %cst_81 = arith.constant dense<0.000000e+00> : vector<128xf32>
    %175 = vector.multi_reduction <add>, %174, %cst_81 [0] : vector<8x128xf32> to vector<128xf32>
    %176 = vector.shape_cast %175 : vector<128xf32> to vector<1x128xf32>
    %177 = vector.broadcast %3 : f32 to vector<1x128xf32>
    %178 = arith.addf %176, %177 : vector<1x128xf32>
    %179 = arith.mulf %178, %2 : vector<1x128xf32>
    %c12 = arith.constant 12 : index
    %180 = memref.load %arg4[%c12] : memref<16xf32, #tpu.memory_space<smem>>
    %181 = vector.broadcast %180 : f32 to vector<1x128xf32>
    %182 = arith.mulf %179, %181 : vector<1x128xf32>
    %c12_82 = arith.constant 12 : index
    %183 = memref.load %arg5[%c12_82] : memref<16xf32, #tpu.memory_space<smem>>
    %184 = vector.broadcast %183 : f32 to vector<1x128xf32>
    %185 = arith.addf %182, %184 : vector<1x128xf32>
    %c0_83 = arith.constant 0 : index
    %c3_84 = arith.constant 3 : index
    %c0_85 = arith.constant 0 : index
    %c9_86 = arith.constant 9 : index
    %186 = vector.load %arg1[%c0_83, %c3_84, %c0_85, %c9_86] : memref<1x4x8x256xf32, #tpu.memory_space<vmem>>, vector<1x1x8x128xf32>
    %187 = vector.shape_cast %186 : vector<1x1x8x128xf32> to vector<8x128xf32>
    %188 = arith.mulf %187, %0 : vector<8x128xf32>
    %cst_87 = arith.constant dense<0.000000e+00> : vector<128xf32>
    %189 = vector.multi_reduction <add>, %188, %cst_87 [0] : vector<8x128xf32> to vector<128xf32>
    %190 = vector.shape_cast %189 : vector<128xf32> to vector<1x128xf32>
    %191 = vector.broadcast %3 : f32 to vector<1x128xf32>
    %192 = arith.addf %190, %191 : vector<1x128xf32>
    %193 = arith.mulf %192, %2 : vector<1x128xf32>
    %c13 = arith.constant 13 : index
    %194 = memref.load %arg4[%c13] : memref<16xf32, #tpu.memory_space<smem>>
    %195 = vector.broadcast %194 : f32 to vector<1x128xf32>
    %196 = arith.mulf %193, %195 : vector<1x128xf32>
    %c13_88 = arith.constant 13 : index
    %197 = memref.load %arg5[%c13_88] : memref<16xf32, #tpu.memory_space<smem>>
    %198 = vector.broadcast %197 : f32 to vector<1x128xf32>
    %199 = arith.addf %196, %198 : vector<1x128xf32>
    %c0_89 = arith.constant 0 : index
    %c2_90 = arith.constant 2 : index
    %c0_91 = arith.constant 0 : index
    %c10_92 = arith.constant 10 : index
    %200 = vector.load %arg1[%c0_89, %c2_90, %c0_91, %c10_92] : memref<1x4x8x256xf32, #tpu.memory_space<vmem>>, vector<1x1x8x128xf32>
    %201 = vector.shape_cast %200 : vector<1x1x8x128xf32> to vector<8x128xf32>
    %202 = arith.mulf %201, %0 : vector<8x128xf32>
    %cst_93 = arith.constant dense<0.000000e+00> : vector<128xf32>
    %203 = vector.multi_reduction <add>, %202, %cst_93 [0] : vector<8x128xf32> to vector<128xf32>
    %204 = vector.shape_cast %203 : vector<128xf32> to vector<1x128xf32>
    %205 = vector.broadcast %3 : f32 to vector<1x128xf32>
    %206 = arith.addf %204, %205 : vector<1x128xf32>
    %207 = arith.mulf %206, %2 : vector<1x128xf32>
    %c14 = arith.constant 14 : index
    %208 = memref.load %arg4[%c14] : memref<16xf32, #tpu.memory_space<smem>>
    %209 = vector.broadcast %208 : f32 to vector<1x128xf32>
    %210 = arith.mulf %207, %209 : vector<1x128xf32>
    %c14_94 = arith.constant 14 : index
    %211 = memref.load %arg5[%c14_94] : memref<16xf32, #tpu.memory_space<smem>>
    %212 = vector.broadcast %211 : f32 to vector<1x128xf32>
    %213 = arith.addf %210, %212 : vector<1x128xf32>
    %c0_95 = arith.constant 0 : index
    %c3_96 = arith.constant 3 : index
    %c0_97 = arith.constant 0 : index
    %c10_98 = arith.constant 10 : index
    %214 = vector.load %arg1[%c0_95, %c3_96, %c0_97, %c10_98] : memref<1x4x8x256xf32, #tpu.memory_space<vmem>>, vector<1x1x8x128xf32>
    %215 = vector.shape_cast %214 : vector<1x1x8x128xf32> to vector<8x128xf32>
    %216 = arith.mulf %215, %0 : vector<8x128xf32>
    %cst_99 = arith.constant dense<0.000000e+00> : vector<128xf32>
    %217 = vector.multi_reduction <add>, %216, %cst_99 [0] : vector<8x128xf32> to vector<128xf32>
    %218 = vector.shape_cast %217 : vector<128xf32> to vector<1x128xf32>
    %219 = vector.broadcast %3 : f32 to vector<1x128xf32>
    %220 = arith.addf %218, %219 : vector<1x128xf32>
    %221 = arith.mulf %220, %2 : vector<1x128xf32>
    %c15 = arith.constant 15 : index
    %222 = memref.load %arg4[%c15] : memref<16xf32, #tpu.memory_space<smem>>
    %223 = vector.broadcast %222 : f32 to vector<1x128xf32>
    %224 = arith.mulf %221, %223 : vector<1x128xf32>
    %c15_100 = arith.constant 15 : index
    %225 = memref.load %arg5[%c15_100] : memref<16xf32, #tpu.memory_space<smem>>
    %226 = vector.broadcast %225 : f32 to vector<1x128xf32>
    %227 = arith.addf %224, %226 : vector<1x128xf32>
    %228 = tpu.concatenate %17, %31, %45, %59, %73, %87, %101, %115, %129, %143, %157, %171, %185, %199, %213, %227 in 0 : vector<1x128xf32>, vector<1x128xf32>, vector<1x128xf32>, vector<1x128xf32>, vector<1x128xf32>, vector<1x128xf32>, vector<1x128xf32>, vector<1x128xf32>, vector<1x128xf32>, vector<1x128xf32>, vector<1x128xf32>, vector<1x128xf32>, vector<1x128xf32>, vector<1x128xf32>, vector<1x128xf32>, vector<1x128xf32> -> vector<16x128xf32>
    %cst_101 = arith.constant dense<0xFF800000> : vector<128xf32>
    %229 = vector.multi_reduction <maximumf>, %228, %cst_101 [0] : vector<16x128xf32> to vector<128xf32>
    %230 = vector.shape_cast %229 : vector<128xf32> to vector<1x128xf32>
    %231 = vector.broadcast %230 : vector<1x128xf32> to vector<16x128xf32>
    %232 = arith.subf %228, %231 : vector<16x128xf32>
    %233 = math.exp %232 : vector<16x128xf32>
    %cst_102 = arith.constant dense<0.000000e+00> : vector<128xf32>
    %234 = vector.multi_reduction <add>, %233, %cst_102 [0] : vector<16x128xf32> to vector<128xf32>
    %235 = vector.shape_cast %234 : vector<128xf32> to vector<1x128xf32>
    %236 = tpu.reciprocal %235 {approx = true} : vector<1x128xf32> -> vector<1x128xf32>
    %237 = vector.broadcast %236 : vector<1x128xf32> to vector<16x128xf32>
    %238 = arith.mulf %233, %237 : vector<16x128xf32>
    %cst_103 = arith.constant 0.000000e+00 : f32
    %239 = vector.broadcast %cst_103 : f32 to vector<8x128xf32>
    %c0_104 = arith.constant 0 : index
    %c0_105 = arith.constant 0 : index
    %c0_106 = arith.constant 0 : index
    %c0_107 = arith.constant 0 : index
    %240 = vector.load %arg1[%c0_104, %c0_105, %c0_106, %c0_107] : memref<1x4x8x256xf32, #tpu.memory_space<vmem>>, vector<1x1x8x128xf32>
    %241 = vector.shape_cast %240 : vector<1x1x8x128xf32> to vector<8x128xf32>
    %242 = vector.extract_strided_slice %238 {offsets = [0, 0], sizes = [1, 128], strides = [1, 1]} : vector<16x128xf32> to vector<1x128xf32>
    %243 = vector.broadcast %242 : vector<1x128xf32> to vector<8x128xf32>
    %244 = arith.mulf %241, %243 : vector<8x128xf32>
    %245 = arith.addf %239, %244 : vector<8x128xf32>
    %c0_108 = arith.constant 0 : index
    %c1_109 = arith.constant 1 : index
    %c0_110 = arith.constant 0 : index
    %c0_111 = arith.constant 0 : index
    %246 = vector.load %arg1[%c0_108, %c1_109, %c0_110, %c0_111] : memref<1x4x8x256xf32, #tpu.memory_space<vmem>>, vector<1x1x8x128xf32>
    %247 = vector.shape_cast %246 : vector<1x1x8x128xf32> to vector<8x128xf32>
    %248 = vector.extract_strided_slice %238 {offsets = [1, 0], sizes = [1, 128], strides = [1, 1]} : vector<16x128xf32> to vector<1x128xf32>
    %249 = vector.broadcast %248 : vector<1x128xf32> to vector<8x128xf32>
    %250 = arith.mulf %247, %249 : vector<8x128xf32>
    %251 = arith.addf %245, %250 : vector<8x128xf32>
    %c0_112 = arith.constant 0 : index
    %c0_113 = arith.constant 0 : index
    %c0_114 = arith.constant 0 : index
    %c1_115 = arith.constant 1 : index
    %252 = vector.load %arg1[%c0_112, %c0_113, %c0_114, %c1_115] : memref<1x4x8x256xf32, #tpu.memory_space<vmem>>, vector<1x1x8x128xf32>
    %253 = vector.shape_cast %252 : vector<1x1x8x128xf32> to vector<8x128xf32>
    %254 = vector.extract_strided_slice %238 {offsets = [2, 0], sizes = [1, 128], strides = [1, 1]} : vector<16x128xf32> to vector<1x128xf32>
    %255 = vector.broadcast %254 : vector<1x128xf32> to vector<8x128xf32>
    %256 = arith.mulf %253, %255 : vector<8x128xf32>
    %257 = arith.addf %251, %256 : vector<8x128xf32>
    %c0_116 = arith.constant 0 : index
    %c1_117 = arith.constant 1 : index
    %c0_118 = arith.constant 0 : index
    %c1_119 = arith.constant 1 : index
    %258 = vector.load %arg1[%c0_116, %c1_117, %c0_118, %c1_119] : memref<1x4x8x256xf32, #tpu.memory_space<vmem>>, vector<1x1x8x128xf32>
    %259 = vector.shape_cast %258 : vector<1x1x8x128xf32> to vector<8x128xf32>
    %260 = vector.extract_strided_slice %238 {offsets = [3, 0], sizes = [1, 128], strides = [1, 1]} : vector<16x128xf32> to vector<1x128xf32>
    %261 = vector.broadcast %260 : vector<1x128xf32> to vector<8x128xf32>
    %262 = arith.mulf %259, %261 : vector<8x128xf32>
    %263 = arith.addf %257, %262 : vector<8x128xf32>
    %c0_120 = arith.constant 0 : index
    %c2_121 = arith.constant 2 : index
    %c0_122 = arith.constant 0 : index
    %c0_123 = arith.constant 0 : index
    %264 = vector.load %arg1[%c0_120, %c2_121, %c0_122, %c0_123] : memref<1x4x8x256xf32, #tpu.memory_space<vmem>>, vector<1x1x8x128xf32>
    %265 = vector.shape_cast %264 : vector<1x1x8x128xf32> to vector<8x128xf32>
    %266 = vector.extract_strided_slice %238 {offsets = [4, 0], sizes = [1, 128], strides = [1, 1]} : vector<16x128xf32> to vector<1x128xf32>
    %267 = vector.broadcast %266 : vector<1x128xf32> to vector<8x128xf32>
    %268 = arith.mulf %265, %267 : vector<8x128xf32>
    %269 = arith.addf %263, %268 : vector<8x128xf32>
    %c0_124 = arith.constant 0 : index
    %c3_125 = arith.constant 3 : index
    %c0_126 = arith.constant 0 : index
    %c0_127 = arith.constant 0 : index
    %270 = vector.load %arg1[%c0_124, %c3_125, %c0_126, %c0_127] : memref<1x4x8x256xf32, #tpu.memory_space<vmem>>, vector<1x1x8x128xf32>
    %271 = vector.shape_cast %270 : vector<1x1x8x128xf32> to vector<8x128xf32>
    %272 = vector.extract_strided_slice %238 {offsets = [5, 0], sizes = [1, 128], strides = [1, 1]} : vector<16x128xf32> to vector<1x128xf32>
    %273 = vector.broadcast %272 : vector<1x128xf32> to vector<8x128xf32>
    %274 = arith.mulf %271, %273 : vector<8x128xf32>
    %275 = arith.addf %269, %274 : vector<8x128xf32>
    %c0_128 = arith.constant 0 : index
    %c2_129 = arith.constant 2 : index
    %c0_130 = arith.constant 0 : index
    %c1_131 = arith.constant 1 : index
    %276 = vector.load %arg1[%c0_128, %c2_129, %c0_130, %c1_131] : memref<1x4x8x256xf32, #tpu.memory_space<vmem>>, vector<1x1x8x128xf32>
    %277 = vector.shape_cast %276 : vector<1x1x8x128xf32> to vector<8x128xf32>
    %278 = vector.extract_strided_slice %238 {offsets = [6, 0], sizes = [1, 128], strides = [1, 1]} : vector<16x128xf32> to vector<1x128xf32>
    %279 = vector.broadcast %278 : vector<1x128xf32> to vector<8x128xf32>
    %280 = arith.mulf %277, %279 : vector<8x128xf32>
    %281 = arith.addf %275, %280 : vector<8x128xf32>
    %c0_132 = arith.constant 0 : index
    %c3_133 = arith.constant 3 : index
    %c0_134 = arith.constant 0 : index
    %c1_135 = arith.constant 1 : index
    %282 = vector.load %arg1[%c0_132, %c3_133, %c0_134, %c1_135] : memref<1x4x8x256xf32, #tpu.memory_space<vmem>>, vector<1x1x8x128xf32>
    %283 = vector.shape_cast %282 : vector<1x1x8x128xf32> to vector<8x128xf32>
    %284 = vector.extract_strided_slice %238 {offsets = [7, 0], sizes = [1, 128], strides = [1, 1]} : vector<16x128xf32> to vector<1x128xf32>
    %285 = vector.broadcast %284 : vector<1x128xf32> to vector<8x128xf32>
    %286 = arith.mulf %283, %285 : vector<8x128xf32>
    %287 = arith.addf %281, %286 : vector<8x128xf32>
    %c0_136 = arith.constant 0 : index
    %c0_137 = arith.constant 0 : index
    %c0_138 = arith.constant 0 : index
    %c9_139 = arith.constant 9 : index
    %288 = vector.load %arg1[%c0_136, %c0_137, %c0_138, %c9_139] : memref<1x4x8x256xf32, #tpu.memory_space<vmem>>, vector<1x1x8x128xf32>
    %289 = vector.shape_cast %288 : vector<1x1x8x128xf32> to vector<8x128xf32>
    %290 = vector.extract_strided_slice %238 {offsets = [8, 0], sizes = [1, 128], strides = [1, 1]} : vector<16x128xf32> to vector<1x128xf32>
    %291 = vector.broadcast %290 : vector<1x128xf32> to vector<8x128xf32>
    %292 = arith.mulf %289, %291 : vector<8x128xf32>
    %293 = arith.addf %287, %292 : vector<8x128xf32>
    %c0_140 = arith.constant 0 : index
    %c1_141 = arith.constant 1 : index
    %c0_142 = arith.constant 0 : index
    %c9_143 = arith.constant 9 : index
    %294 = vector.load %arg1[%c0_140, %c1_141, %c0_142, %c9_143] : memref<1x4x8x256xf32, #tpu.memory_space<vmem>>, vector<1x1x8x128xf32>
    %295 = vector.shape_cast %294 : vector<1x1x8x128xf32> to vector<8x128xf32>
    %296 = vector.extract_strided_slice %238 {offsets = [9, 0], sizes = [1, 128], strides = [1, 1]} : vector<16x128xf32> to vector<1x128xf32>
    %297 = vector.broadcast %296 : vector<1x128xf32> to vector<8x128xf32>
    %298 = arith.mulf %295, %297 : vector<8x128xf32>
    %299 = arith.addf %293, %298 : vector<8x128xf32>
    %c0_144 = arith.constant 0 : index
    %c0_145 = arith.constant 0 : index
    %c0_146 = arith.constant 0 : index
    %c10_147 = arith.constant 10 : index
    %300 = vector.load %arg1[%c0_144, %c0_145, %c0_146, %c10_147] : memref<1x4x8x256xf32, #tpu.memory_space<vmem>>, vector<1x1x8x128xf32>
    %301 = vector.shape_cast %300 : vector<1x1x8x128xf32> to vector<8x128xf32>
    %302 = vector.extract_strided_slice %238 {offsets = [10, 0], sizes = [1, 128], strides = [1, 1]} : vector<16x128xf32> to vector<1x128xf32>
    %303 = vector.broadcast %302 : vector<1x128xf32> to vector<8x128xf32>
    %304 = arith.mulf %301, %303 : vector<8x128xf32>
    %305 = arith.addf %299, %304 : vector<8x128xf32>
    %c0_148 = arith.constant 0 : index
    %c1_149 = arith.constant 1 : index
    %c0_150 = arith.constant 0 : index
    %c10_151 = arith.constant 10 : index
    %306 = vector.load %arg1[%c0_148, %c1_149, %c0_150, %c10_151] : memref<1x4x8x256xf32, #tpu.memory_space<vmem>>, vector<1x1x8x128xf32>
    %307 = vector.shape_cast %306 : vector<1x1x8x128xf32> to vector<8x128xf32>
    %308 = vector.extract_strided_slice %238 {offsets = [11, 0], sizes = [1, 128], strides = [1, 1]} : vector<16x128xf32> to vector<1x128xf32>
    %309 = vector.broadcast %308 : vector<1x128xf32> to vector<8x128xf32>
    %310 = arith.mulf %307, %309 : vector<8x128xf32>
    %311 = arith.addf %305, %310 : vector<8x128xf32>
    %c0_152 = arith.constant 0 : index
    %c2_153 = arith.constant 2 : index
    %c0_154 = arith.constant 0 : index
    %c9_155 = arith.constant 9 : index
    %312 = vector.load %arg1[%c0_152, %c2_153, %c0_154, %c9_155] : memref<1x4x8x256xf32, #tpu.memory_space<vmem>>, vector<1x1x8x128xf32>
    %313 = vector.shape_cast %312 : vector<1x1x8x128xf32> to vector<8x128xf32>
    %314 = vector.extract_strided_slice %238 {offsets = [12, 0], sizes = [1, 128], strides = [1, 1]} : vector<16x128xf32> to vector<1x128xf32>
    %315 = vector.broadcast %314 : vector<1x128xf32> to vector<8x128xf32>
    %316 = arith.mulf %313, %315 : vector<8x128xf32>
    %317 = arith.addf %311, %316 : vector<8x128xf32>
    %c0_156 = arith.constant 0 : index
    %c3_157 = arith.constant 3 : index
    %c0_158 = arith.constant 0 : index
    %c9_159 = arith.constant 9 : index
    %318 = vector.load %arg1[%c0_156, %c3_157, %c0_158, %c9_159] : memref<1x4x8x256xf32, #tpu.memory_space<vmem>>, vector<1x1x8x128xf32>
    %319 = vector.shape_cast %318 : vector<1x1x8x128xf32> to vector<8x128xf32>
    %320 = vector.extract_strided_slice %238 {offsets = [13, 0], sizes = [1, 128], strides = [1, 1]} : vector<16x128xf32> to vector<1x128xf32>
    %321 = vector.broadcast %320 : vector<1x128xf32> to vector<8x128xf32>
    %322 = arith.mulf %319, %321 : vector<8x128xf32>
    %323 = arith.addf %317, %322 : vector<8x128xf32>
    %c0_160 = arith.constant 0 : index
    %c2_161 = arith.constant 2 : index
    %c0_162 = arith.constant 0 : index
    %c10_163 = arith.constant 10 : index
    %324 = vector.load %arg1[%c0_160, %c2_161, %c0_162, %c10_163] : memref<1x4x8x256xf32, #tpu.memory_space<vmem>>, vector<1x1x8x128xf32>
    %325 = vector.shape_cast %324 : vector<1x1x8x128xf32> to vector<8x128xf32>
    %326 = vector.extract_strided_slice %238 {offsets = [14, 0], sizes = [1, 128], strides = [1, 1]} : vector<16x128xf32> to vector<1x128xf32>
    %327 = vector.broadcast %326 : vector<1x128xf32> to vector<8x128xf32>
    %328 = arith.mulf %325, %327 : vector<8x128xf32>
    %329 = arith.addf %323, %328 : vector<8x128xf32>
    %c0_164 = arith.constant 0 : index
    %c3_165 = arith.constant 3 : index
    %c0_166 = arith.constant 0 : index
    %c10_167 = arith.constant 10 : index
    %330 = vector.load %arg1[%c0_164, %c3_165, %c0_166, %c10_167] : memref<1x4x8x256xf32, #tpu.memory_space<vmem>>, vector<1x1x8x128xf32>
    %331 = vector.shape_cast %330 : vector<1x1x8x128xf32> to vector<8x128xf32>
    %332 = vector.extract_strided_slice %238 {offsets = [15, 0], sizes = [1, 128], strides = [1, 1]} : vector<16x128xf32> to vector<1x128xf32>
    %333 = vector.broadcast %332 : vector<1x128xf32> to vector<8x128xf32>
    %334 = arith.mulf %331, %333 : vector<8x128xf32>
    %335 = arith.addf %329, %334 : vector<8x128xf32>
    %c0_168 = arith.constant 0 : index
    %c0_169 = arith.constant 0 : index
    %c0_170 = arith.constant 0 : index
    %336 = vector.load %arg7[%c0_168, %c0_169, %c0_170] : memref<1x8x128xf32, #tpu.memory_space<vmem>>, vector<1x8x128xf32>
    %337 = vector.shape_cast %336 : vector<1x8x128xf32> to vector<8x128xf32>
    %338 = vector.shape_cast %335 : vector<8x128xf32> to vector<1x8x128xf32>
    tpu.vector_store %arg7[%c0_168, %c0_169, %c0_170], %338 {strides = array<i32>} : memref<1x8x128xf32, #tpu.memory_space<vmem>>, vector<1x8x128xf32>,
    return
  }
  func.func @transform_0(%arg0: i32) -> (i32, i32, i32, i32) {
    %c0_i32 = arith.constant 0 : i32
    %c0_i32_0 = arith.constant 0 : i32
    %c0_i32_1 = arith.constant 0 : i32
    %c0_i32_2 = arith.constant 0 : i32
    return %arg0, %c0_i32, %c0_i32_0, %c0_i32_1 : i32, i32, i32, i32
  }
  func.func @transform_1(%arg0: i32) -> (i32, i32, i32) {
    %c0_i32 = arith.constant 0 : i32
    %c0_i32_0 = arith.constant 0 : i32
    %c0_i32_1 = arith.constant 0 : i32
    return %arg0, %c0_i32, %c0_i32_0 : i32, i32, i32
  }
  func.func @transform_2(%arg0: i32) -> (i32, i32) {
    %c0_i32 = arith.constant 0 : i32
    %c0_i32_0 = arith.constant 0 : i32
    %c0_i32_1 = arith.constant 0 : i32
    return %c0_i32, %c0_i32_0 : i32, i32
  }
  func.func @transform_3(%arg0: i32) -> i32 {
    %c0_i32 = arith.constant 0 : i32
    %c0_i32_0 = arith.constant 0 : i32
    return %c0_i32 : i32
  }
  func.func @transform_4(%arg0: i32) -> i32 {
    %c0_i32 = arith.constant 0 : i32
    %c0_i32_0 = arith.constant 0 : i32
    return %c0_i32 : i32
  }
  func.func @transform_5(%arg0: i32) -> i32 {
    %c0_i32 = arith.constant 0 : i32
    %c0_i32_0 = arith.constant 0 : i32
    return %c0_i32 : i32
  }
  func.func @transform_6(%arg0: i32) -> (i32, i32, i32) {
    %c0_i32 = arith.constant 0 : i32
    %c0_i32_0 = arith.constant 0 : i32
    %c0_i32_1 = arith.constant 0 : i32
    return %arg0, %c0_i32, %c0_i32_0 : i32, i32, i32
  }
}

</mosaic_0001>

<bundles_post_ra>
// kernel: attention_downsampler_forward.1
= control target key start
LH: loop header
LB: loop body
LE: loop exit
PB: predicated region body
PF: predicated region fallthrough
CT: control target
= control target key end

     0   :  { %s2011_s0 = inlined_call_operand.vmem [shape: f32[2,4,8,256], index: 0, kind: input, shape index: {}]   ;;  %s2012_s1 = inlined_call_operand.vmem [shape: f32[2,1,128], index: 1, kind: input, shape index: {}]   ;;  %s2013_s2 = inlined_call_operand.vmem [shape: f32[8,128], index: 2, kind: input, shape index: {}]   ;;  %s2014_s3 = inlined_call_operand.vmem [shape: f32[16], index: 3, kind: input, shape index: {}]   ;;  %s2015_s4 = inlined_call_operand.vmem [shape: f32[16], index: 4, kind: input, shape index: {}]   ;;  %s2016_s5 = inlined_call_operand.<no memory space> [shape: f32[1], index: 5, kind: input, shape index: {}]   ;;  %s2017_s6 = inlined_call_operand.vmem [shape: f32[2,8,128], index: 6, kind: output, shape index: {}]  }
   0x1   :  { %2026 = sst [smem:[#allocation9_spill]] %s2012_s1 }
   0x2   :  { %2027 = sst [smem:[#allocation10_spill]] %s2013_s2 }
   0x3   :  { %11 = sst [smem:[#allocation2]] %s2016_s5 }
   0x4   :  { %12 = vsyncpa [#allocation4], 0 }
   0x5   :  { %13 = vsyncpa [#allocation6], 0  ;;  %s1439_s23 = smov 0  }
   0x6 LB: > { %s1445_s24 = sadd.s32 4294967295, %s1391_s23   ;;  %p1250_p0 = scmp.ge.s32.totalorder %s1391_s23, 1  ;;  %s1391_s23 = sphi %s1439_s23, %s19_s23  }
   0x7   : > { %p186_p1 = scmp.lt.s32.totalorder %s1391_s23, 3  ;;  %s202_s26 = sshll.u32 %s2014_s3, 4  ;;  %s203_s26 = int_to_ptr.vmem [resolvable:$true] %s202_s26 }
   0x8   : > { %p2018_p3 = scmp.eq.s32.totalorder %s1445_s24, 0  ;;  %s213_s30 = sshll.u32 %s2015_s4, 4  ;;  %s214_s30 = int_to_ptr.vmem [resolvable:$true] %s213_s30 }
   0x9   : > { %p1452_p2 = pnand %p1250_p0, %p186_p1  ;;  %s1347_s8 = scalar_lea.vmem %s203_s26, 16 }
   0xa   : > { %p1348_p6 = scmp.ne.s32.totalorder %s203_s26, %s1347_s8  ;;  %p1355_p10 = scmp.lt.s32.totalorder %s203_s26, %s203_s26 }
   0xb   : > { %s2028_s27 = scalar_select %p1452_p2, 1, 0 }
   0xc   : > { %p1310_p4 = pneg %p1452_p2  ;;  %p1356_p11 = scmp.lt.s32.totalorder %s1347_s8, %s1347_s8 }
   0xe   : > { %p1464_p5 = pnand %p2018_p3, %p1310_p4  ;;  %p1357_p12 = por %p1356_p11, %p1355_p10 }
  0x10   : > { %p1349_p7 = pneg %p1464_p5 }
  0x12   : > { %p1350_p8 = pnand %p1349_p7, %p1348_p6 }
  0x14   : > { %p1351_p9 = pneg %p1350_p8 }
  0x16   : > { %p1358_p13 = pnand %p1357_p12, %p1351_p9 }
  0x18   : > { %1361 = shalt.err (!%p1358_p13)
}
  0x19   : > { %s1393_s9 = smov [#allocation3]   ;;  %s1362_s10 = scalar_lea.vmem %s214_s30, 16 }
  0x1a   : > { %1313 = dma.vmem_to_smem (!%p1464_p5), %s203_s26, 16, %s1393_s9, [#allocation4]  }
  0x1b   : > { %p1363_p0 = scmp.ne.s32.totalorder %s214_s30, %s1362_s10  ;;  %p1370_p3 = scmp.lt.s32.totalorder %s214_s30, %s214_s30 }
  0x1c   : > { %p1371_p2 = scmp.lt.s32.totalorder %s1362_s10, %s1362_s10 }
  0x1d   : > { %p1365_p1 = pnand %p1363_p0, %p1349_p7 }
  0x1e   : > { %p1372_p6 = por %p1371_p2, %p1370_p3 }
  0x1f   : > { %p1366_p4 = pneg %p1365_p1 }
  0x21   : > { %p1373_p8 = pnand %p1372_p6, %p1366_p4 }
  0x23   : > { %1376 = shalt.err (!%p1373_p8)
}
  0x24   : > { %s1394_s11 = smov [#allocation5]   ;;  %p2030_p9 = scmp.ne.s32.totalorder %s2028_s27, 0 }
  0x25   : > { %1316 = dma.vmem_to_smem (!%p1464_p5), %s214_s30, 16, %s1394_s11, [#allocation6]  }
  0x26   : > { %243 = sbr.rel (%p2030_p9) target bundleno = 719 (0x2cf), region = 44  ;;  %p2031_p10 = scmp.eq.s32.totalorder (!%p2030_p9), %s1445_s24, 0 }
  0x2d   : > { %1382 = dma.done.wait (%p2031_p10), [#allocation4], 16   ;;  %p2032_p11 = pmov %p2031_p10 }
  0x2e   : > { %p2033_p7 = pmov %p2031_p10 }
  0x2f   : > { %1384 = vsyncadd (%p2032_p11), [#allocation4], 4294967280 }
  0x30   : > { %1386 = dma.done.wait (%p2033_p7), [#allocation6], 16   ;;  %p2034_p2 = pmov %p2033_p7 }
  0x32   : > { %1388 = vsyncadd (%p2034_p2), [#allocation6], 4294967280 }
  0x33   : > { %253 = sfence }
  0x34   : > { %s2035_s2 = sld [smem:[#allocation10_spill]]  ;;  %v356_v1 = vlaneseq  ;;  %s2022_s14 = smov 9   ;;  %vm510_vm0 = vcmask 72704   ;;  %vm502_vm1 = vcmask 1047624   ;;  %vm574_vm2 = vcmask 80896  }
  0x35   : > { %s2020_s15 = smov 10   ;;  %p280_p3 = scmp.lt.s32.totalorder %s1445_s24, 1  ;;  %vm345_vm3 = vcmask 7168   ;;  %vm337_vm4 = vcmask 1047560   ;;  %vm566_vm5 = vcmask 1047632   ;;  %vm748_vm6 = vcmask 1039360  }
  0x36   : > { %v1494_v2 = vshrl.u32 %v356_v1, 7  ;;  %s2024_s16 = smov 1   ;;  %s2036_s1 = sld [smem:[#allocation9_spill]]  ;;  %vm867_vm7 = vcmask 1040384   ;;  %vm869_vm8 = vcmask 1041408   ;;  %vm814_vm9 = vcmask 965632  }
  0x37   : > { %s2049_s24 = smov (!%p280_p3, %s1445_s24), 1  ;;  %s294_s20 = sld [smem:[#allocation2]]  ;;  %vm871_vm10 = vcmask 1042432   ;;  %vm793_vm11 = vcmask 973824   ;;  %vm873_vm12 = vcmask 1043456   ;;  %vm875_vm13 = vcmask 1044480  }
  0x38   : > { %v1500_v3 = vsub.s32 0, %v1494_v2  ;;  %s1515_s21 = sld [smem:[#allocation3 + $0x8]]  ;;  %s1519_s25 = sld [smem:[#allocation3 + $0x9]]  ;;  %vm877_vm14 = vcmask 1045504   ;;  %vm879_vm15 = vcmask 1046528  }
  0x39   : > { %s1517_s22 = sld [smem:[#allocation5 + $0x8]]  ;;  %s1301_s5 = sshll.u32 %s2049_s24, 6 }
  0x3a   : > { %v1487_v0 = vld [vmem:[%s2035_s2] sm:$0xff]  ;;  %s1522_s26 = sld [smem:[#allocation5 + $0x9]]  ;;  %s1524_s27 = sld [smem:[#allocation3 + $0x2]] }
  0x3b   : > { %497 = vrot.lane.b32.xlu0 %v1487_v0, %s2022_s14  ;;  %561 = vrot.lane.b32.xlu1 %v1487_v0, %s2020_s15  ;;  %s1526_s28 = sld [smem:[#allocation5 + $0x2]]  ;;  %s1532_s7 = sld [smem:[#allocation3 + $0x3]] }
  0x3c   : > { %s287_s19 = scalar_lea.vmem %s2036_s1, %s2049_s24  ;;  %s1528_s29 = sld [smem:[#allocation3 + $0xa]] }
  0x3d   : > { %v1508_v4 = vld [vmem:[%s287_s19] sm:$0x1]  ;;  %s1530_s30 = sld [smem:[#allocation5 + $0xa]]  ;;  %s1534_s8 = sld [smem:[#allocation3 + $0xb]]  ;;  %v1561_v6 = vstv %s294_s20 }
  0x3e   : > { %v359_v5 = vrot.slane %v1508_v4, %v1500_v3  ;;  %s1536_s9 = sld [smem:[#allocation5 + $0x3]]  ;;  %s1540_s11 = sld [smem:[#allocation3 + $0xc]]  ;;  %v526_v7 = vstv %s1515_s21  ;;  %v554_v12 = vstv %s1519_s25 }
  0x3f   : > { %332 = vrot.lane.b32.xlu0 %v1487_v0, %s2024_s16  ;;  %s1538_s10 = sld [smem:[#allocation5 + $0xb]]  ;;  %s1542_s12 = sld [smem:[#allocation5 + $0xc]]  ;;  %v530_v9 = vstv %s1517_s22 }
  0x40   : > { %520 = vrot.lane.b32.xlu1 %v359_v5, %s2022_s14  ;;  %s1544_s13 = sld [smem:[#allocation3 + $0xd]]  ;;  %s1548_s18 = sld [smem:[#allocation3 + $0x6]]  ;;  %v558_v13 = vstv %s1522_s26  ;;  %v366_v15 = vstv %s1524_s27 }
  0x41   : > { %s1546_s17 = sld [smem:[#allocation5 + $0xd]]  ;;  %s1550_s19 = sld [smem:[#allocation3 + $0xe]]  ;;  %v370_v16 = vstv %s1526_s28  ;;  %v396_v19 = vstv %s1532_s7 }
  0x42   : > { %s1554_s14 = sld [smem:[#allocation5 + $0xe]]  ;;  %s1559_s2 = scalar_lea.vmem %s2011_s0, %s1301_s5  ;;  %v590_v17 = vstv %s1528_s29 }
  0x43   : > { %360 = vrot.lane.b32.xlu0 %v359_v5, %s2024_s16  ;;  %v330_v8 = vld [vmem:[%s1559_s2 + $0x8] sm:$0xff]  ;;  %v1567_v10 = vld [vmem:[%s1559_s2] sm:$0xff]  ;;  %v1570_v11 = vld [vmem:[%s1559_s2 + $0x18] sm:$0xff]  ;;  %s1398_s1 = smov 119   ;;  %s1399_s16 = smov 127  }
  0x44   : > { %584 = vrot.lane.b32.xlu1 %v359_v5, %s2020_s15  ;;  %s1552_s15 = sld [smem:[#allocation5 + $0x6]]  ;;  %v1575_v14 = vld [vmem:[%s1559_s2 + $0x10] sm:$0xff]  ;;  %v594_v18 = vstv %s1530_s30  ;;  %v400_v20 = vstv %s1536_s9  ;;  %s1400_s20 = smov 118  }
  0x45   : > { %v618_v21 = vstv %s1534_s8  ;;  %v622_v22 = vstv %s1538_s10  ;;  %v646_v23 = vstv %s1540_s11  ;;  %v650_v24 = vstv %s1542_s12  ;;  %s1728_s21 = sld [smem:[#allocation3 + $0x7]]  ;;  %s1262_s26 = sld [smem:[#allocation5 + $0x1]] }
  0x46   : > { %v674_v25 = vstv %s1544_s13  ;;  %s1807_s22 = sld [smem:[#allocation5 + $0x7]]  ;;  %s1270_s27 = sld [smem:[#allocation3 + $0x4]] }
  0x47   : > { %v678_v26 = vstv %s1546_s17  ;;  %s1813_s25 = sld [smem:[#allocation3 + $0xf]]  ;;  %s309_s28 = sld [smem:[#allocation5]] }
  0x48   : > { %s1828_s5 = sld [smem:[#allocation5 + $0xf]]  ;;  %s1273_s29 = sld [smem:[#allocation3 + $0x5]] }
  0x49   : > { %s1271_s30 = sld [smem:[#allocation5 + $0x4]]  ;;  %s1274_s7 = sld [smem:[#allocation5 + $0x5]] }
  0x4a   : > { %s2045_s8 = smov 1   ;;  %s2046_s9 = smov 9  }
  0x4b   : > { %s2047_s10 = smov 10  }
  0xad   : > { %v1589_v27 = vpop.permute.xlu0 %497  ;;  %v1591_v28 = vpop.permute.xlu1 %561 }
  0xae   : > { %v501_v33 = vmul.f32 %v1589_v27, %v330_v8  ;;  %v500_v34 = vmul.f32 %v1589_v27, %v1567_v10  ;;  %v534_v35 = vmul.f32 %v1570_v11, %v1589_v27  ;;  %v533_v36 = vmul.f32 %v1575_v14, %v1589_v27 }
  0xaf   : > { %v565_v37 = vmul.f32 %v1591_v28, %v330_v8  ;;  %v564_v38 = vmul.f32 %v1591_v28, %v1567_v10  ;;  %v1609_v39 = vmul.f32 %v1570_v11, %v1591_v28  ;;  %v1613_v40 = vmul.f32 %v1575_v14, %v1591_v28 }
  0xb0   : > { %v511_v41 = vsel %vm510_vm0, %v501_v33, 0.0  ;;  %v503_v42 = vsel %vm502_vm1, %v500_v34, 0.0  ;;  %v542_v43 = vsel %vm510_vm0, %v534_v35, 0.0  ;;  %v535_v44 = vsel %vm502_vm1, %v533_v36, 0.0 }
  0xb1   : > { %v1619_v45 = vpop.permute.xlu0 %332  ;;  %v512_v46 = vrot.slane %v511_v41, 4  ;;  %v504_v47 = vrot.slane %v503_v42, 4  ;;  %v543_v48 = vrot.slane %v542_v43, 4  ;;  %v536_v49 = vrot.slane %v535_v44, 4 }
  0xb2   : > { %v336_v50 = vmul.f32 %v1619_v45, %v330_v8  ;;  %v335_v51 = vmul.f32 %v1619_v45, %v1567_v10  ;;  %v575_v52 = vsel %vm574_vm2, %v565_v37, 0.0  ;;  %v567_v53 = vsel %vm566_vm5, %v564_v38, 0.0 }
  0xb3   : > { %v513_v54 = vadd.f32 %v512_v46, %v511_v41  ;;  %v505_v55 = vadd.f32 %v504_v47, %v503_v42  ;;  %v544_v56 = vadd.f32 %v543_v48, %v542_v43  ;;  %v537_v57 = vadd.f32 %v536_v49, %v535_v44  ;;  %v1628_v47 = vpop.permute.xlu1 %520 }
  0xb4   : > { %v346_v58 = vsel %vm345_vm3, %v336_v50, 0.0  ;;  %v338_v59 = vsel %vm337_vm4, %v335_v51, 0.0  ;;  %v576_v60 = vrot.slane %v575_v52, 4  ;;  %v568_v61 = vrot.slane %v567_v53, 4 }
  0xb5   : > { %v514_v62 = vrot.slane %v513_v54, 2  ;;  %v506_v63 = vrot.slane %v505_v55, 2  ;;  %v545_v1 = vrot.slane %v544_v56, 2  ;;  %v538_v5 = vrot.slane %v537_v57, 2 }
  0xb6   : > { %v347_v8 = vrot.slane %v346_v58, 4  ;;  %v339_v33 = vrot.slane %v338_v59, 4  ;;  %v577_v34 = vadd.f32 %v576_v60, %v575_v52  ;;  %v569_v35 = vadd.f32 %v568_v61, %v567_v53 }
  0xb7   : > { %v515_v36 = vadd.f32 %v514_v62, %v513_v54  ;;  %v507_v37 = vadd.f32 %v506_v63, %v505_v55  ;;  %v546_v38 = vadd.f32 %v545_v1, %v544_v56  ;;  %v539_v41 = vadd.f32 %v538_v5, %v537_v57 }
  0xb8   : > { %v348_v42 = vadd.f32 %v347_v8, %v346_v58  ;;  %v340_v43 = vadd.f32 %v339_v33, %v338_v59  ;;  %v578_v44 = vrot.slane %v577_v34, 2  ;;  %v570_v46 = vrot.slane %v569_v35, 2 }
  0xb9   : > { %v516_v48 = vrot.slane %v515_v36, 1  ;;  %v508_v49 = vrot.slane %v507_v37, 1  ;;  %v547_v50 = vrot.slane %v546_v38, 1  ;;  %v540_v51 = vrot.slane %v539_v41, 1 }
  0xba   : > { %v349_v32 = vrot.slane %v348_v42, 2  ;;  %v341_v30 = vrot.slane %v340_v43, 2  ;;  %v579_v31 = vadd.f32 %v578_v44, %v577_v34  ;;  %v571_v29 = vadd.f32 %v570_v46, %v569_v35 }
  0xbb   : > { %v517_v52 = vadd.f32 %v516_v48, %v515_v36  ;;  %v509_v53 = vadd.f32 %v508_v49, %v507_v37  ;;  %v548_v54 = vadd.f32 %v547_v50, %v546_v38  ;;  %v541_v55 = vadd.f32 %v540_v51, %v539_v41 }
  0xbc   : > { %v350_v56 = vadd.f32 %v349_v32, %v348_v42  ;;  %v342_v57 = vadd.f32 %v341_v30, %v340_v43  ;;  %v580_v58 = vrot.slane %v579_v31, 1  ;;  %v572_v59 = vrot.slane %v571_v29, 1  ;;  %v1634_v32 = vpop.permute.xlu1 %584 }
  0xbd   : > { %v519_v60 = vadd.f32 %v517_v52, %v1561_v6  ;;  %v518_v61 = vadd.f32 %v509_v53, %v1561_v6  ;;  %v550_v62 = vadd.f32 %v548_v54, %v1561_v6  ;;  %v549_v63 = vadd.f32 %v541_v55, %v1561_v6 }
  0xbe   : > { %v351_v1 = vrot.slane %v350_v56, 1  ;;  %v343_v5 = vrot.slane %v342_v57, 1  ;;  %v581_v8 = vadd.f32 %v580_v58, %v579_v31  ;;  %v573_v33 = vadd.f32 %v572_v59, %v571_v29  ;;  %v1642_v31 = vpop.permute.xlu0 %360 }
  0xbf   : > { %v524_v30 = vmul.f32 %v1628_v47, %v519_v60  ;;  %v523_v34 = vmul.f32 %v1628_v47, %v518_v61  ;;  %v552_v35 = vmul.f32 %v550_v62, %v1628_v47  ;;  %v551_v36 = vmul.f32 %v549_v63, %v1628_v47 }
  0xc0   : > { %v352_v37 = vadd.f32 %v351_v1, %v350_v56  ;;  %v344_v38 = vadd.f32 %v343_v5, %v342_v57  ;;  %v583_v41 = vadd.f32 %v581_v8, %v1561_v6  ;;  %v582_v29 = vadd.f32 %v573_v33, %v1561_v6  ;;  %v1691_v8 = vld [vmem:[%s1559_s2 + $0x28] sm:$0xff]  ;;  %v1694_v33 = vld [vmem:[%s1559_s2 + $0x20] sm:$0xff] }
  0xc1   : > { %v528_v42 = vmul.f32 %v526_v7, %v524_v30  ;;  %v527_v43 = vmul.f32 %v526_v7, %v523_v34  ;;  %v556_v44 = vmul.f32 %v554_v12, %v552_v35  ;;  %v555_v46 = vmul.f32 %v554_v12, %v551_v36 }
  0xc2   : > { %v354_v48 = vadd.f32 %v352_v37, %v1561_v6  ;;  %v353_v49 = vadd.f32 %v344_v38, %v1561_v6  ;;  %v588_v50 = vmul.f32 %v1634_v32, %v583_v41  ;;  %v587_v51 = vmul.f32 %v1634_v32, %v582_v29  ;;  %v1703_v38 = vld [vmem:[%s1559_s2 + $0x38] sm:$0xff] }
  0xc3   : > { %v532_v52 = vadd.f32 %v530_v9, %v528_v42  ;;  %v531_v53 = vadd.f32 %v530_v9, %v527_v43  ;;  %v560_v7 = vadd.f32 %v558_v13, %v556_v44  ;;  %v559_v12 = vadd.f32 %v558_v13, %v555_v46 }
  0xc4   : > { %v364_v54 = vmul.f32 %v1642_v31, %v354_v48  ;;  %v363_v55 = vmul.f32 %v1642_v31, %v353_v49  ;;  %v592_v56 = vmul.f32 %v590_v17, %v588_v50  ;;  %v591_v57 = vmul.f32 %v590_v17, %v587_v51 }
  0xc5   : > { %791 = vrot.lane.b32.xlu1 %v532_v52, %s1398_s1  ;;  %789 = vrot.lane.b32.xlu0 %v531_v53, %s1398_s1  ;;  %v799_v9 = vrot.slane %v560_v7, 7  ;;  %v798_v58 = vrot.slane %v559_v12, 7  ;;  %v376_v13 = vmul.f32 %v1570_v11, %v1619_v45  ;;  %v375_v59 = vmul.f32 %v1575_v14, %v1619_v45 }
  0xc6   : > { %v368_v60 = vmul.f32 %v366_v15, %v364_v54  ;;  %v367_v17 = vmul.f32 %v366_v15, %v363_v55  ;;  %v596_v61 = vadd.f32 %v594_v18, %v592_v56  ;;  %v595_v62 = vadd.f32 %v594_v18, %v591_v57 }
  0xc7   : > { %v384_v63 = vsel %vm345_vm3, %v376_v13, 0.0  ;;  %v377_v1 = vsel %vm337_vm4, %v375_v59, 0.0  ;;  %v606_v11 = vsel %vm574_vm2, %v1609_v39, 0.0  ;;  %v599_v5 = vsel %vm566_vm5, %v1613_v40, 0.0  ;;  %v1706_v40 = vld [vmem:[%s1559_s2 + $0x30] sm:$0xff] }
  0xc8   : > { %v372_v15 = vadd.f32 %v370_v16, %v368_v60  ;;  %v371_v18 = vadd.f32 %v370_v16, %v367_v17  ;;  %v809_v30 = vrot.slane %v596_v61, 6  ;;  %v808_v34 = vrot.slane %v595_v62, 6 }
  0xc9   : > { %802 = vrot.lane.b32.xlu1 %v799_v9, %s1398_s1  ;;  %800 = vrot.lane.b32.xlu0 %v798_v58, %s1398_s1  ;;  %v385_v35 = vrot.slane %v384_v63, 4  ;;  %v378_v36 = vrot.slane %v377_v1, 4  ;;  %v607_v39 = vrot.slane %v606_v11, 4  ;;  %v600_v37 = vrot.slane %v599_v5, 4 }
  0xca   : > { %v743_v41 = vrot.slane %v372_v15, 6  ;;  %v742_v29 = vrot.slane %v371_v18, 6  ;;  %v626_v42 = vmul.f32 %v1691_v8, %v1589_v27  ;;  %v625_v16 = vmul.f32 %v1694_v33, %v1589_v27 }
  0xcb   : > { %v386_v43 = vadd.f32 %v385_v35, %v384_v63  ;;  %v379_v44 = vadd.f32 %v378_v36, %v377_v1  ;;  %v608_v46 = vadd.f32 %v607_v39, %v606_v11  ;;  %v601_v48 = vadd.f32 %v600_v37, %v599_v5 }
  0xcc   : > { %v634_v49 = vsel %vm510_vm0, %v626_v42, 0.0  ;;  %v627_v50 = vsel %vm502_vm1, %v625_v16, 0.0  ;;  %v654_v51 = vmul.f32 %v1703_v38, %v1589_v27  ;;  %v653_v52 = vmul.f32 %v1706_v40, %v1589_v27 }
  0xcd   : > { %746 = vrot.lane.b32.xlu1 %v743_v41, %s1399_s16  ;;  %744 = vrot.lane.b32.xlu0 %v742_v29, %s1399_s16  ;;  %v387_v53 = vrot.slane %v386_v43, 2  ;;  %v380_v7 = vrot.slane %v379_v44, 2  ;;  %v609_v12 = vrot.slane %v608_v46, 2  ;;  %v602_v54 = vrot.slane %v601_v48, 2 }
  0xce   : > { %v635_v55 = vrot.slane %v634_v49, 4  ;;  %v628_v56 = vrot.slane %v627_v50, 4  ;;  %v662_v57 = vsel %vm510_vm0, %v654_v51, 0.0  ;;  %v655_v9 = vsel %vm502_vm1, %v653_v52, 0.0 }
  0xcf   : > { %v388_v58 = vadd.f32 %v387_v53, %v386_v43  ;;  %v381_v13 = vadd.f32 %v380_v7, %v379_v44  ;;  %v610_v59 = vadd.f32 %v609_v12, %v608_v46  ;;  %v603_v60 = vadd.f32 %v602_v54, %v601_v48 }
  0xd0   : > { %v636_v27 = vadd.f32 %v635_v55, %v634_v49  ;;  %v629_v17 = vadd.f32 %v628_v56, %v627_v50  ;;  %v663_v61 = vrot.slane %v662_v57, 4  ;;  %v656_v62 = vrot.slane %v655_v9, 4 }
  0xd1   : > { %812 = vrot.lane.b32.xlu1 %v809_v30, %s1400_s20  ;;  %810 = vrot.lane.b32.xlu0 %v808_v34, %s1400_s20  ;;  %v389_v63 = vrot.slane %v388_v58, 1  ;;  %v382_v1 = vrot.slane %v381_v13, 1  ;;  %v611_v11 = vrot.slane %v610_v59, 1  ;;  %v604_v5 = vrot.slane %v603_v60, 1 }
  0xd2   : > { %v637_v15 = vrot.slane %v636_v27, 2  ;;  %v630_v18 = vrot.slane %v629_v17, 2  ;;  %v664_v35 = vadd.f32 %v663_v61, %v662_v57  ;;  %v657_v36 = vadd.f32 %v656_v62, %v655_v9 }
  0xd3   : > { %v390_v39 = vadd.f32 %v389_v63, %v388_v58  ;;  %v383_v37 = vadd.f32 %v382_v1, %v381_v13  ;;  %v612_v41 = vadd.f32 %v611_v11, %v610_v59  ;;  %v605_v29 = vadd.f32 %v604_v5, %v603_v60 }
  0xd4   : > { %v638_v42 = vadd.f32 %v637_v15, %v636_v27  ;;  %v631_v16 = vadd.f32 %v630_v18, %v629_v17  ;;  %v665_v43 = vrot.slane %v664_v35, 2  ;;  %v658_v44 = vrot.slane %v657_v36, 2 }
  0xd5   : > { %v392_v30 = vadd.f32 %v390_v39, %v1561_v6  ;;  %v391_v34 = vadd.f32 %v383_v37, %v1561_v6  ;;  %v614_v46 = vadd.f32 %v612_v41, %v1561_v6  ;;  %v613_v48 = vadd.f32 %v605_v29, %v1561_v6 }
  0xd6   : > { %v639_v49 = vrot.slane %v638_v42, 1  ;;  %v632_v50 = vrot.slane %v631_v16, 1  ;;  %v666_v51 = vadd.f32 %v665_v43, %v664_v35  ;;  %v659_v52 = vadd.f32 %v658_v44, %v657_v36 }
  0xd7   : > { %v394_v53 = vmul.f32 %v392_v30, %v1642_v31  ;;  %v393_v7 = vmul.f32 %v391_v34, %v1642_v31  ;;  %v616_v12 = vmul.f32 %v614_v46, %v1634_v32  ;;  %v615_v54 = vmul.f32 %v613_v48, %v1634_v32 }
  0xd8   : > { %v640_v55 = vadd.f32 %v639_v49, %v638_v42  ;;  %v633_v56 = vadd.f32 %v632_v50, %v631_v16  ;;  %v667_v57 = vrot.slane %v666_v51, 1  ;;  %v660_v9 = vrot.slane %v659_v52, 1 }
  0xd9   : > { %v398_v58 = vmul.f32 %v396_v19, %v394_v53  ;;  %v397_v13 = vmul.f32 %v396_v19, %v393_v7  ;;  %v620_v59 = vmul.f32 %v618_v21, %v616_v12  ;;  %v619_v60 = vmul.f32 %v618_v21, %v615_v54 }
  0xda   : > { %v642_v27 = vadd.f32 %v640_v55, %v1561_v6  ;;  %v641_v17 = vadd.f32 %v633_v56, %v1561_v6  ;;  %v668_v61 = vadd.f32 %v667_v57, %v666_v51  ;;  %v661_v62 = vadd.f32 %v660_v9, %v659_v52 }
  0xdb   : > { %v402_v63 = vadd.f32 %v400_v20, %v398_v58  ;;  %v401_v1 = vadd.f32 %v400_v20, %v397_v13  ;;  %v624_v11 = vadd.f32 %v622_v22, %v620_v59  ;;  %v623_v19 = vadd.f32 %v622_v22, %v619_v60 }
  0xdc   : > { %v644_v5 = vmul.f32 %v642_v27, %v1628_v47  ;;  %v643_v21 = vmul.f32 %v641_v17, %v1628_v47  ;;  %v670_v15 = vadd.f32 %v668_v61, %v1561_v6  ;;  %v669_v18 = vadd.f32 %v661_v62, %v1561_v6 }
  0xdd   : > { %v754_v35 = vrot.slane %v402_v63, 5  ;;  %v753_v36 = vrot.slane %v401_v1, 5  ;;  %v820_v39 = vrot.slane %v624_v11, 5  ;;  %v490_v20 = vstv %s1728_s21 }
  0xde   : > { %v648_v37 = vmul.f32 %v646_v23, %v644_v5  ;;  %v647_v22 = vmul.f32 %v646_v23, %v643_v21  ;;  %v672_v41 = vmul.f32 %v670_v15, %v1628_v47  ;;  %v671_v29 = vmul.f32 %v669_v18, %v1628_v47 }
  0xdf   : > { %757 = vrot.lane.b32.xlu1 %v754_v35, %s1399_s16  ;;  %755 = vrot.lane.b32.xlu0 %v753_v36, %s1399_s16  ;;  %v819_v42 = vrot.slane %v623_v19, 5  ;;  %v440_v16 = vmul.f32 %v1691_v8, %v1619_v45  ;;  %v439_v43 = vmul.f32 %v1694_v33, %v1619_v45  ;;  %v682_v23 = vmul.f32 %v1691_v8, %v1591_v28 }
  0xe0   : > { %v652_v44 = vadd.f32 %v650_v24, %v648_v37  ;;  %v651_v47 = vadd.f32 %v650_v24, %v647_v22  ;;  %v676_v30 = vmul.f32 %v674_v25, %v672_v41  ;;  %v675_v34 = vmul.f32 %v674_v25, %v671_v29 }
  0xe1   : > { %v448_v46 = vsel %vm345_vm3, %v440_v16, 0.0  ;;  %v441_v48 = vsel %vm337_vm4, %v439_v43, 0.0  ;;  %v690_v49 = vsel %vm574_vm2, %v682_v23, 0.0  ;;  %v681_v50 = vmul.f32 %v1694_v33, %v1591_v28 }
  0xe2   : > { %v830_v51 = vrot.slane %v652_v44, 4  ;;  %v829_v52 = vrot.slane %v651_v47, 4  ;;  %v680_v53 = vadd.f32 %v678_v26, %v676_v30  ;;  %v679_v7 = vadd.f32 %v678_v26, %v675_v34 }
  0xe3   : > { %823 = vrot.lane.b32.xlu1 %v820_v39, %s1400_s20  ;;  %821 = vrot.lane.b32.xlu0 %v819_v42, %s1400_s20  ;;  %v449_v24 = vrot.slane %v448_v46, 4  ;;  %v442_v25 = vrot.slane %v441_v48, 4  ;;  %v691_v12 = vrot.slane %v690_v49, 4  ;;  %v683_v54 = vsel %vm566_vm5, %v681_v50, 0.0 }
  0xe4   : > { %v840_v55 = vrot.slane %v680_v53, 3  ;;  %v839_v56 = vrot.slane %v679_v7, 3  ;;  %v684_v57 = vrot.slane %v683_v54, 4  ;;  %v470_v9 = vmul.f32 %v1703_v38, %v1619_v45 }
  0xe5   : > { %v450_v58 = vadd.f32 %v449_v24, %v448_v46  ;;  %v443_v13 = vadd.f32 %v442_v25, %v441_v48  ;;  %v692_v59 = vadd.f32 %v691_v12, %v690_v49  ;;  %v469_v26 = vmul.f32 %v1706_v40, %v1619_v45 }
  0xe6   : > { %v685_v60 = vadd.f32 %v684_v57, %v683_v54  ;;  %v478_v27 = vsel %vm345_vm3, %v470_v9, 0.0  ;;  %v710_v17 = vmul.f32 %v1703_v38, %v1591_v28  ;;  %v709_v61 = vmul.f32 %v1706_v40, %v1591_v28 }
  0xe7   : > { %833 = vrot.lane.b32.xlu1 %v830_v51, %s1398_s1  ;;  %831 = vrot.lane.b32.xlu0 %v829_v52, %s1398_s1  ;;  %v451_v62 = vrot.slane %v450_v58, 2  ;;  %v444_v63 = vrot.slane %v443_v13, 2  ;;  %v693_v1 = vrot.slane %v692_v59, 2  ;;  %v479_v11 = vrot.slane %v478_v27, 4 }
  0xe8   : > { %v686_v19 = vrot.slane %v685_v60, 2  ;;  %v471_v45 = vsel %vm337_vm4, %v469_v26, 0.0  ;;  %v718_v5 = vsel %vm574_vm2, %v710_v17, 0.0  ;;  %v711_v21 = vsel %vm566_vm5, %v709_v61, 0.0 }
  0xe9   : > { %v452_v15 = vadd.f32 %v451_v62, %v450_v58  ;;  %v445_v18 = vadd.f32 %v444_v63, %v443_v13  ;;  %v694_v35 = vadd.f32 %v693_v1, %v692_v59  ;;  %v480_v36 = vadd.f32 %v479_v11, %v478_v27 }
  0xea   : > { %v687_v28 = vadd.f32 %v686_v19, %v685_v60  ;;  %v472_v39 = vrot.slane %v471_v45, 4  ;;  %v719_v37 = vrot.slane %v718_v5, 4  ;;  %v712_v22 = vrot.slane %v711_v21, 4 }
  0xeb   : > { %843 = vrot.lane.b32.xlu1 %v840_v55, %s1398_s1  ;;  %841 = vrot.lane.b32.xlu0 %v839_v56, %s1398_s1  ;;  %v453_v41 = vrot.slane %v452_v15, 1  ;;  %v446_v29 = vrot.slane %v445_v18, 1  ;;  %v695_v42 = vrot.slane %v694_v35, 1  ;;  %v481_v16 = vrot.slane %v480_v36, 2 }
  0xec   : > { %v688_v43 = vrot.slane %v687_v28, 1  ;;  %v473_v23 = vadd.f32 %v472_v39, %v471_v45  ;;  %v720_v44 = vadd.f32 %v719_v37, %v718_v5  ;;  %v713_v47 = vadd.f32 %v712_v22, %v711_v21 }
  0xed   : > { %v454_v30 = vadd.f32 %v453_v41, %v452_v15  ;;  %v447_v34 = vadd.f32 %v446_v29, %v445_v18  ;;  %v696_v46 = vadd.f32 %v695_v42, %v694_v35  ;;  %v482_v48 = vadd.f32 %v481_v16, %v480_v36 }
  0xee   : > { %v689_v49 = vadd.f32 %v688_v43, %v687_v28  ;;  %v474_v50 = vrot.slane %v473_v23, 2  ;;  %v721_v51 = vrot.slane %v720_v44, 2  ;;  %v714_v52 = vrot.slane %v713_v47, 2 }
  0xef   : > { %v456_v53 = vadd.f32 %v454_v30, %v1561_v6  ;;  %v455_v7 = vadd.f32 %v447_v34, %v1561_v6  ;;  %v698_v24 = vadd.f32 %v696_v46, %v1561_v6  ;;  %v483_v25 = vrot.slane %v482_v48, 1 }
  0xf0   : > { %v697_v12 = vadd.f32 %v689_v49, %v1561_v6  ;;  %v475_v54 = vadd.f32 %v474_v50, %v473_v23  ;;  %v722_v55 = vadd.f32 %v721_v51, %v720_v44  ;;  %v715_v56 = vadd.f32 %v714_v52, %v713_v47 }
  0xf1   : > { %v458_v57 = vmul.f32 %v456_v53, %v1642_v31  ;;  %v457_v9 = vmul.f32 %v455_v7, %v1642_v31  ;;  %v700_v58 = vmul.f32 %v698_v24, %v1634_v32  ;;  %v484_v13 = vadd.f32 %v483_v25, %v482_v48 }
  0xf2   : > { %v699_v59 = vmul.f32 %v697_v12, %v1634_v32  ;;  %v476_v26 = vrot.slane %v475_v54, 1  ;;  %v723_v60 = vrot.slane %v722_v55, 1  ;;  %v716_v27 = vrot.slane %v715_v56, 1 }
  0xf3   : > { %v2037_v17 = vstv %s1548_s18  ;;  %v2039_v1 = vstv %s1550_s19  ;;  %v486_v19 = vadd.f32 %v484_v13, %v1561_v6  ;;  %v2041_v35 = vstv %s1552_s15  ;;  %s306_s15 = sld [smem:[#allocation3]] }
  0xf4   : > { %v462_v61 = vmul.f32 %v2037_v17, %v458_v57  ;;  %v2038_v62 = vmov %v2037_v17  ;;  %v704_v11 = vmul.f32 %v2039_v1, %v700_v58  ;;  %v2040_v45 = vmov %v2039_v1 }
  0xf5   : > { %v461_v63 = vmul.f32 %v2038_v62, %v457_v9  ;;  %v703_v5 = vmul.f32 %v2040_v45, %v699_v59  ;;  %v477_v21 = vadd.f32 %v476_v26, %v475_v54  ;;  %v724_v15 = vadd.f32 %v723_v60, %v722_v55 }
  0xf6   : > { %v717_v18 = vadd.f32 %v716_v27, %v715_v56  ;;  %v466_v36 = vadd.f32 %v2041_v35, %v462_v61  ;;  %v2042_v28 = vmov %v2041_v35  ;;  %v488_v37 = vmul.f32 %v486_v19, %v1642_v31 }
  0xf7   : > { %v465_v39 = vadd.f32 %v2042_v28, %v461_v63  ;;  %v494_v22 = vstv %s1807_s22  ;;  %v2043_v41 = vstv %s1554_s14  ;;  %v485_v42 = vadd.f32 %v477_v21, %v1561_v6  ;;  %s1261_s14 = sld [smem:[#allocation3 + $0x1]] }
  0xf8   : > { %v708_v29 = vadd.f32 %v2043_v41, %v704_v11  ;;  %v726_v16 = vadd.f32 %v724_v15, %v1561_v6  ;;  %v725_v43 = vadd.f32 %v717_v18, %v1561_v6  ;;  %v770_v23 = vrot.slane %v466_v36, 2 }
  0xf9   : > { %v769_v44 = vrot.slane %v465_v39, 2  ;;  %v2044_v47 = vmov %v2043_v41  ;;  %v492_v34 = vmul.f32 %v490_v20, %v488_v37  ;;  %v487_v46 = vmul.f32 %v485_v42, %v1642_v31 }
  0xfa   : > { %v707_v30 = vadd.f32 %v2044_v47, %v703_v5  ;;  %v728_v48 = vmul.f32 %v726_v16, %v1634_v32  ;;  %v730_v49 = vstv %s1813_s25  ;;  %v727_v50 = vmul.f32 %v725_v43, %v1634_v32  ;;  %773 = vrot.lane.b32.xlu1 %v770_v23, %s1399_s16 }
  0xfb   : > { %771 = vrot.lane.b32.xlu0 %v769_v44, %s1399_s16  ;;  %v850_v51 = vrot.slane %v708_v29, 2  ;;  %v491_v52 = vmul.f32 %v490_v20, %v487_v46  ;;  %v496_v7 = vadd.f32 %v494_v22, %v492_v34  ;;  %v734_v54 = vstv %s1828_s5 }
  0xfc   : > { %v849_v53 = vrot.slane %v707_v30, 2  ;;  %v732_v24 = vmul.f32 %v730_v49, %v728_v48  ;;  %v731_v25 = vmul.f32 %v730_v49, %v727_v50  ;;  %v314_v13 = vmul.f32 %v1575_v14, %v1487_v0 }
  0xfd   : > { %v495_v12 = vadd.f32 %v494_v22, %v491_v52  ;;  %v780_v31 = vrot.slane %v496_v7, 1  ;;  %v296_v60 = vmul.f32 %v1567_v10, %v1487_v0  ;;  %v405_v17 = vmul.f32 %v1694_v33, %v1487_v0 }
  0xfe   : > { %853 = vrot.lane.b32.xlu1 %v850_v51, %s1400_s20  ;;  %v736_v32 = vadd.f32 %v734_v54, %v732_v24  ;;  %v735_v56 = vadd.f32 %v734_v54, %v731_v25  ;;  %v315_v27 = vrot.slane %v314_v13, 4  ;;  %v422_v14 = vmul.f32 %v1706_v40, %v1487_v0 }
  0xff   : > { %851 = vrot.lane.b32.xlu0 %v849_v53, %s1400_s20  ;;  %v779_v55 = vrot.slane %v495_v12, 1  ;;  %v297_v61 = vrot.slane %v296_v60, 4  ;;  %v406_v11 = vrot.slane %v405_v17, 4  ;;  %v324_v51 = vstv %s1261_s14 }
 0x100   : > { %v860_v57 = vrot.slane %v736_v32, 1  ;;  %v859_v20 = vrot.slane %v735_v56, 1  ;;  %v316_v62 = vadd.f32 %v315_v27, %v314_v13  ;;  %v423_v5 = vrot.slane %v422_v14, 4 }
 0x101   : > { %v298_v19 = vadd.f32 %v297_v61, %v296_v60  ;;  %v407_v21 = vadd.f32 %v406_v11, %v405_v17  ;;  %v307_v54 = vstv %s306_s15  ;;  %v310_v27 = vstv %s309_s28 }
 0x102   : > { %783 = vrot.lane.b32.xlu1 %v780_v31, %s1399_s16  ;;  %v317_v45 = vrot.slane %v316_v62, 2  ;;  %v424_v36 = vadd.f32 %v423_v5, %v422_v14  ;;  %v327_v31 = vstv %s1262_s26 }
 0x103   : > { %781 = vrot.lane.b32.xlu0 %v779_v55, %s1399_s16  ;;  %v299_v15 = vrot.slane %v298_v19, 2  ;;  %v408_v28 = vrot.slane %v407_v21, 2 }
 0x104   : > { %v318_v10 = vadd.f32 %v317_v45, %v316_v62  ;;  %v425_v29 = vrot.slane %v424_v36, 2  ;;  %v432_v62 = vstv %s1273_s29 }
 0x105   : > { %v300_v39 = vadd.f32 %v299_v15, %v298_v19  ;;  %v409_v42 = vadd.f32 %v408_v28, %v407_v21  ;;  %v418_v19 = vstv %s1271_s30  ;;  %v435_v15 = vstv %s1274_s7 }
 0x106   : > { %863 = vrot.lane.b32.xlu1 %v860_v57, %s1400_s20  ;;  %v319_v37 = vrot.slane %v318_v10, 1  ;;  %v426_v43 = vadd.f32 %v425_v29, %v424_v36 }
 0x107   : > { %861 = vrot.lane.b32.xlu0 %v859_v20, %s1400_s20  ;;  %v301_v0 = vrot.slane %v300_v39, 1  ;;  %v410_v23 = vrot.slane %v409_v42, 1  ;;  %v415_v20 = vstv %s1270_s27 }
 0x108   : > { %v320_v16 = vadd.f32 %v319_v37, %v318_v10  ;;  %v427_v46 = vrot.slane %v426_v43, 1 }
 0x109   : > { %v302_v44 = vadd.f32 %v301_v0, %v300_v39  ;;  %v411_v48 = vadd.f32 %v410_v23, %v409_v42 }
 0x10a   : > { %v321_v47 = vadd.f32 %v320_v16, %v1561_v6  ;;  %v428_v7 = vadd.f32 %v427_v46, %v426_v43 }
 0x10b   : > { %v304_v49 = vadd.f32 %v1561_v6, %v302_v44  ;;  %v412_v24 = vadd.f32 %v411_v48, %v1561_v6 }
 0x10c   : > { %v322_v50 = vmul.f32 %v321_v47, %v1508_v4  ;;  %v429_v55 = vadd.f32 %v428_v7, %v1561_v6 }
 0x10d   : > { %v305_v25 = vmul.f32 %v304_v49, %v1508_v4  ;;  %v413_v32 = vmul.f32 %v412_v24, %v1508_v4 }
 0x10e   : > { %v325_v12 = vmul.f32 %v324_v51, %v322_v50  ;;  %v430_v17 = vmul.f32 %v429_v55, %v1508_v4 }
 0x10f   : > { %v308_v56 = vmul.f32 %v307_v54, %v305_v25  ;;  %v416_v61 = vmul.f32 %v415_v20, %v413_v32 }
 0x110   : > { %v328_v57 = vadd.f32 %v327_v31, %v325_v12  ;;  %v433_v5 = vmul.f32 %v432_v62, %v430_v17 }
 0x111   : > { %v311_v14 = vadd.f32 %v310_v27, %v308_v56  ;;  %v419_v21 = vadd.f32 %v418_v19, %v416_v61 }
 0x112   : > { %v738_v11 = vrot.slane %v328_v57, 7  ;;  %v436_v28 = vadd.f32 %v435_v15, %v433_v5 }
 0x113   : > { %v762_v0 = vrot.slane %v419_v21, 4  ;;  %v925_v21 = vsub.s32 2, %v1494_v2 }
 0x114   : > { %v868_v36 = vsel %vm867_vm7, %v311_v14, %v738_v11 }
 0x137   : > { %v1860_v9 = vpop.permute.xlu1 %791  ;;  %v1862_v58 = vpop.permute.xlu0 %789 }
 0x13b   : > { %v1866_v59 = vpop.permute.xlu1 %802  ;;  %v1868_v26 = vpop.permute.xlu0 %800 }
 0x13c   : > { %v804_v29 = vsel %vm793_vm11, %v1868_v26, %v1866_v59  ;;  %v765_v26 = vrot.slane %v436_v28, 3  ;;  %v963_v28 = vsub.s32 4, %v1494_v2 }
 0x13f   : > { %v1874_v63 = vpop.permute.xlu1 %746  ;;  %v1876_v1 = vpop.permute.xlu0 %744 }
 0x140   : > { %v749_v10 = vsel %vm748_vm6, %v1876_v1, %v1874_v63 }
 0x141   : > { %v870_v42 = vsel %vm869_vm8, %v868_v36, %v749_v10  ;;  %v919_v10 = vsub.s32 1, %v1494_v2 }
 0x143   : > { %v1880_v18 = vpop.permute.xlu1 %812  ;;  %v1882_v35 = vpop.permute.xlu0 %810 }
 0x144   : > { %v815_v63 = vsel %vm814_vm9, %v1882_v35, %v1880_v18 }
 0x151   : > { %v758_v22 = vpop.permute.xlu1 %757  ;;  %v756_v41 = vpop.permute.xlu0 %755 }
 0x152   : > { %v759_v4 = vsel %vm748_vm6, %v756_v41, %v758_v22  ;;  %v794_v22 = vsel %vm793_vm11, %v1862_v58, %v1860_v9 }
 0x153   : > { %v872_v1 = vsel %vm871_vm10, %v870_v42, %v759_v4  ;;  %v881_v16 = vsel %vm867_vm7, %v794_v22, %v804_v29  ;;  %v969_v4 = vsub.s32 5, %v1494_v2  ;;  %v994_v29 = vsub.s32 7, %v1494_v2 }
 0x154   : > { %v882_v44 = vsel %vm869_vm8, %v881_v16, %v815_v63  ;;  %v874_v18 = vsel %vm873_vm12, %v872_v1, %v762_v0  ;;  %v975_v42 = vsub.s32 6, %v1494_v2 }
 0x155   : > { %v824_v30 = vpop.permute.xlu1 %823  ;;  %v822_v34 = vpop.permute.xlu0 %821  ;;  %v876_v48 = vsel %vm875_vm13, %v874_v18, %v765_v26  ;;  %v1343_v26 = vld [vmem:[%s1559_s2 + $0x10] sm:$0xff] }
 0x156   : > { %v825_v41 = vsel %vm814_vm9, %v822_v34, %v824_v30 }
 0x157   : > { %v883_v47 = vsel %vm871_vm10, %v882_v44, %v825_v41 }
 0x159   : > { %v834_v52 = vpop.permute.xlu1 %833  ;;  %v832_v53 = vpop.permute.xlu0 %831 }
 0x15a   : > { %v835_v59 = vsel %vm793_vm11, %v832_v53, %v834_v52 }
 0x15b   : > { %v884_v30 = vsel %vm873_vm12, %v883_v47, %v835_v59 }
 0x15d   : > { %v844_v13 = vpop.permute.xlu1 %843  ;;  %v842_v60 = vpop.permute.xlu0 %841 }
 0x15e   : > { %v845_v35 = vsel %vm793_vm11, %v842_v60, %v844_v13 }
 0x15f   : > { %v885_v46 = vsel %vm875_vm13, %v884_v30, %v845_v35 }
 0x16c   : > { %v774_v45 = vpop.permute.xlu1 %773 }
 0x16d   : > { %v772_v6 = vpop.permute.xlu0 %771 }
 0x16e   : > { %v775_v9 = vsel %vm748_vm6, %v772_v6, %v774_v45  ;;  %v944_v6 = vsub.s32 3, %v1494_v2  ;;  %v1344_v2 = vld [vmem:[%s1559_s2] sm:$0xff] }
 0x16f   : > { %v878_v51 = vsel %vm877_vm14, %v876_v48, %v775_v9 }
 0x170   : > { %v854_v39 = vpop.permute.xlu1 %853 }
 0x171   : > { %v852_v37 = vpop.permute.xlu0 %851 }
 0x172   : > { %v855_v58 = vsel %vm814_vm9, %v852_v37, %v854_v39 }
 0x173   : > { %v886_v52 = vsel %vm877_vm14, %v885_v46, %v855_v58 }
 0x174   : > { %v784_v43 = vpop.permute.xlu1 %783 }
 0x175   : > { %v782_v23 = vpop.permute.xlu0 %781 }
 0x176   : > { %v785_v34 = vsel %vm748_vm6, %v782_v23, %v784_v43 }
 0x177   : > { %v880_v7 = vsel %vm879_vm15, %v878_v51, %v785_v34 }
 0x178   : > { %v864_v49 = vpop.permute.xlu1 %863 }
 0x179   : > { %v862_v50 = vpop.permute.xlu0 %861 }
 0x17a   : > { %v865_v53 = vsel %vm814_vm9, %v862_v50, %v864_v49  ;;  %v1345_v49 = vld [vmem:[%s1559_s2 + $0x8] sm:$0xff] }
 0x17b   : > { %v887_v24 = vsel %vm879_vm15, %v886_v52, %v865_v53  ;;  %v1346_v53 = vld [vmem:[%s1559_s2 + $0x18] sm:$0xff]  ;;  %s1259_s2 = sshll.u32 %s2049_s24, 3 }
 0x17c   : > { %v888_v25 = vmax.f32 %v880_v7, %v887_v24  ;;  %s291_s13 = scalar_lea.vmem %s2017_s6, %s1259_s2 }
 0x17e   : > { %v889_v12 = vrot.slane %v888_v25, 4 }
 0x180   : > { %v890_v54 = vmax.f32 %v888_v25, %v889_v12 }
 0x182   : > { %v891_v31 = vrot.slane %v890_v54, 2 }
 0x184   : > { %v892_v55 = vmax.f32 %v890_v54, %v891_v31 }
 0x186   : > { %v893_v32 = vrot.slane %v892_v55, 1 }
 0x188   : > { %v894_v56 = vmax.f32 %v892_v55, %v893_v32 }
 0x18a   : > { %v895_v57 = vsub.f32 %v880_v7, %v894_v56  ;;  %v896_v20 = vsub.f32 %v887_v24, %v894_v56 }
 0x18c   : > { %v897_v13 = vmul.f32 1.442695, %v895_v57  ;;  %v899_v60 = vmul.f32 1.442695, %v896_v20 }
 0x18e   : > { %1337 = vpow2.f32 %v897_v13 }
 0x18f   : > { %1339 = vpow2.f32 %v899_v60 }
 0x198   : > { %v1338_v27 = vpop.eup %1337 }
 0x199   : > { %v1340_v17 = vpop.eup %1339 }
 0x19a   : > { %v901_v61 = vadd.f32 %v1340_v17, %v1338_v27 }
 0x19c   : > { %v902_v62 = vrot.slane %v901_v61, 4 }
 0x19e   : > { %v903_v14 = vadd.f32 %v902_v62, %v901_v61 }
 0x1a0   : > { %v904_v11 = vrot.slane %v903_v14, 2 }
 0x1a2   : > { %v905_v19 = vadd.f32 %v904_v11, %v903_v14 }
 0x1a4   : > { %v906_v45 = vrot.slane %v905_v19, 1 }
 0x1a6   : > { %v907_v5 = vadd.f32 %v906_v45, %v905_v19 }
 0x1a8   : > { %1341 = vrcp.f32 %v907_v5 }
 0x1b2   : > { %v1342_v15 = vpop.eup %1341 }
 0x1b3   : > { %v909_v36 = vmul.f32 %v1342_v15, %v1338_v27  ;;  %v910_v1 = vmul.f32 %v1342_v15, %v1340_v17 }
 0x1b5   : > { %v945_v39 = vrot.slane %v909_v36, %v944_v6  ;;  %v926_v37 = vrot.slane %v909_v36, %v925_v21  ;;  %v920_v0 = vrot.slane %v909_v36, %v919_v10  ;;  %v1929_v63 = vrot.slane %v909_v36, %v969_v4 }
 0x1b6   : > { %v1931_v22 = vrot.slane %v909_v36, %v963_v28  ;;  %v995_v41 = vrot.slane %v909_v36, %v994_v29  ;;  %v976_v16 = vrot.slane %v909_v36, %v975_v42  ;;  %v914_v59 = vrot.slane %v909_v36, %v1500_v3 }
 0x1b7   : > { %947 = vrot.lane.b32.xlu1 %v945_v39, %s2045_s8  ;;  %928 = vrot.lane.b32.xlu0 %v926_v37, %s2045_s8  ;;  %v921_v43 = vmul.f32 %v1343_v26, %v920_v0  ;;  %v1033_v44 = vrot.slane %v910_v1, %v919_v10  ;;  %v1014_v18 = vrot.slane %v910_v1, %v1500_v3 }
 0x1b8   : > { %v915_v23 = vmul.f32 %v1344_v2, %v914_v59  ;;  %v1071_v47 = vrot.slane %v910_v1, %v944_v6  ;;  %v1052_v9 = vrot.slane %v910_v1, %v925_v21  ;;  %v1109_v58 = vrot.slane %v910_v1, %v969_v4 }
 0x1b9   : > { %v1090_v30 = vrot.slane %v910_v1, %v963_v28  ;;  %v1147_v3 = vrot.slane %v910_v1, %v994_v29  ;;  %v1128_v34 = vrot.slane %v910_v1, %v975_v42  ;;  %v965_v59 = vmul.f32 %v1694_v33, %v1931_v22 }
 0x1ba   : > { %v1939_v35 = vadd.f32 %v921_v43, %v915_v23 }
 0x1bb   : > { %997 = vrot.lane.b32.xlu1 %v995_v41, %s2045_s8  ;;  %978 = vrot.lane.b32.xlu0 %v976_v16, %s2045_s8 }
 0x1bf   : > { %1035 = vrot.lane.b32.xlu1 %v1033_v44, %s2046_s9  ;;  %1016 = vrot.lane.b32.xlu0 %v1014_v18, %s2046_s9 }
 0x1c3   : > { %1073 = vrot.lane.b32.xlu1 %v1071_v47, %s2047_s10  ;;  %1054 = vrot.lane.b32.xlu0 %v1052_v9, %s2047_s10 }
 0x1c7   : > { %1111 = vrot.lane.b32.xlu1 %v1109_v58, %s2046_s9  ;;  %1092 = vrot.lane.b32.xlu0 %v1090_v30, %s2046_s9 }
 0x1cb   : > { %1149 = vrot.lane.b32.xlu1 %v1147_v3, %s2047_s10  ;;  %1130 = vrot.lane.b32.xlu0 %v1128_v34, %s2047_s10 }
 0x229   : > { %v929_v46 = vpop.permute.xlu0 %928  ;;  %v948_v51 = vpop.permute.xlu1 %947 }
 0x22a   : > { %v931_v48 = vmul.f32 %v1344_v2, %v929_v46  ;;  %v932_v50 = vmul.f32 %v1345_v49, %v929_v46  ;;  %v950_v52 = vmul.f32 %v1343_v26, %v948_v51  ;;  %v951_v7 = vmul.f32 %v1346_v53, %v948_v51 }
 0x22c   : > { %937 = vrot.lane.b32.xlu1 %v932_v50, %s1399_s16  ;;  %935 = vrot.lane.b32.xlu0 %v931_v48, %s1399_s16 }
 0x22d   : > { %v979_v24 = vpop.permute.xlu0 %978  ;;  %v998_v54 = vpop.permute.xlu1 %997 }
 0x22e   : > { %v981_v25 = vmul.f32 %v1694_v33, %v979_v24  ;;  %v982_v12 = vmul.f32 %v1691_v8, %v979_v24  ;;  %v1000_v31 = vmul.f32 %v1706_v40, %v998_v54  ;;  %v1001_v55 = vmul.f32 %v1703_v38, %v998_v54 }
 0x230   : > { %956 = vrot.lane.b32.xlu1 %v951_v7, %s1399_s16  ;;  %954 = vrot.lane.b32.xlu0 %v950_v52, %s1399_s16 }
 0x231   : > { %v1017_v32 = vpop.permute.xlu0 %1016  ;;  %v1036_v20 = vpop.permute.xlu1 %1035 }
 0x232   : > { %v1019_v56 = vmul.f32 %v1344_v2, %v1017_v32  ;;  %v1020_v57 = vmul.f32 %v1345_v49, %v1017_v32  ;;  %v1038_v13 = vmul.f32 %v1343_v26, %v1036_v20  ;;  %v1039_v60 = vmul.f32 %v1346_v53, %v1036_v20 }
 0x234   : > { %987 = vrot.lane.b32.xlu1 %v982_v12, %s1399_s16  ;;  %985 = vrot.lane.b32.xlu0 %v981_v25, %s1399_s16 }
 0x235   : > { %v1055_v27 = vpop.permute.xlu0 %1054  ;;  %v1074_v62 = vpop.permute.xlu1 %1073 }
 0x236   : > { %v1057_v17 = vmul.f32 %v1344_v2, %v1055_v27  ;;  %v1058_v61 = vmul.f32 %v1345_v49, %v1055_v27  ;;  %v1076_v14 = vmul.f32 %v1343_v26, %v1074_v62  ;;  %v1077_v11 = vmul.f32 %v1346_v53, %v1074_v62 }
 0x237   : > { %v971_v2 = vmul.f32 %v1706_v40, %v1929_v63 }
 0x238   : > { %1006 = vrot.lane.b32.xlu1 %v1001_v55, %s1399_s16  ;;  %1004 = vrot.lane.b32.xlu0 %v1000_v31, %s1399_s16 }
 0x239   : > { %v1093_v19 = vpop.permute.xlu0 %1092  ;;  %v1112_v6 = vpop.permute.xlu1 %1111 }
 0x23a   : > { %v1095_v45 = vmul.f32 %v1694_v33, %v1093_v19  ;;  %v1096_v5 = vmul.f32 %v1691_v8, %v1093_v19  ;;  %v1114_v21 = vmul.f32 %v1706_v40, %v1112_v6  ;;  %v1115_v15 = vmul.f32 %v1703_v38, %v1112_v6 }
 0x23c   : > { %1025 = vrot.lane.b32.xlu1 %v1020_v57, %s1398_s1  ;;  %1023 = vrot.lane.b32.xlu0 %v1019_v56, %s1398_s1 }
 0x23d   : > { %v1131_v10 = vpop.permute.xlu0 %1130  ;;  %v1150_v28 = vpop.permute.xlu1 %1149 }
 0x23e   : > { %v1133_v36 = vmul.f32 %v1694_v33, %v1131_v10  ;;  %v1134_v4 = vmul.f32 %v1691_v8, %v1131_v10  ;;  %v1152_v39 = vmul.f32 %v1706_v40, %v1150_v28  ;;  %v1153_v37 = vmul.f32 %v1703_v38, %v1150_v28 }
 0x240   : > { %1044 = vrot.lane.b32.xlu1 %v1039_v60, %s1398_s1  ;;  %1042 = vrot.lane.b32.xlu0 %v1038_v13, %s1398_s1 }
 0x244   : > { %1063 = vrot.lane.b32.xlu1 %v1058_v61, %s1400_s20  ;;  %1061 = vrot.lane.b32.xlu0 %v1057_v17, %s1400_s20 }
 0x248   : > { %1082 = vrot.lane.b32.xlu1 %v1077_v11, %s1400_s20  ;;  %1080 = vrot.lane.b32.xlu0 %v1076_v14, %s1400_s20 }
 0x24c   : > { %1101 = vrot.lane.b32.xlu1 %v1096_v5, %s1398_s1  ;;  %1099 = vrot.lane.b32.xlu0 %v1095_v45, %s1398_s1 }
 0x250   : > { %1120 = vrot.lane.b32.xlu1 %v1115_v15, %s1398_s1  ;;  %1118 = vrot.lane.b32.xlu0 %v1114_v21, %s1398_s1 }
 0x254   : > { %1139 = vrot.lane.b32.xlu1 %v1134_v4, %s1400_s20  ;;  %1137 = vrot.lane.b32.xlu0 %v1133_v36, %s1400_s20 }
 0x258   : > { %1158 = vrot.lane.b32.xlu1 %v1153_v37, %s1400_s20  ;;  %1156 = vrot.lane.b32.xlu0 %v1152_v39, %s1400_s20 }
 0x29e   : > { %v938_v29 = vpop.permute.xlu1 %937  ;;  %v936_v42 = vpop.permute.xlu0 %935 }
 0x29f   : > { %v939_v0 = vsel %vm748_vm6, %v936_v42, %v938_v29 }
 0x2a0   : > { %v941_v1 = vadd.f32 %v939_v0, %v1939_v35 }
 0x2a2   : > { %v957_v8 = vpop.permute.xlu1 %956  ;;  %v955_v41 = vpop.permute.xlu0 %954 }
 0x2a3   : > { %v958_v16 = vsel %vm748_vm6, %v955_v41, %v957_v8 }
 0x2a4   : > { %v960_v26 = vadd.f32 %v958_v16, %v941_v1 }
 0x2a6   : > { %v966_v43 = vadd.f32 %v965_v59, %v960_v26  ;;  %v988_v38 = vpop.permute.xlu1 %987  ;;  %v986_v23 = vpop.permute.xlu0 %985 }
 0x2a7   : > { %v989_v46 = vsel %vm748_vm6, %v986_v23, %v988_v38 }
 0x2a8   : > { %v972_v44 = vadd.f32 %v971_v2, %v966_v43 }
 0x2aa   : > { %v1007_v18 = vpop.permute.xlu1 %1006  ;;  %v1005_v47 = vpop.permute.xlu0 %1004  ;;  %v991_v48 = vadd.f32 %v989_v46, %v972_v44 }
 0x2ab   : > { %v1008_v33 = vsel %vm748_vm6, %v1005_v47, %v1007_v18 }
 0x2ac   : > { %v1010_v40 = vadd.f32 %v1008_v33, %v991_v48 }
 0x2ae   : > { %v1026_v9 = vpop.permute.xlu1 %1025  ;;  %v1024_v58 = vpop.permute.xlu0 %1023 }
 0x2af   : > { %v1027_v50 = vsel %vm793_vm11, %v1024_v58, %v1026_v9 }
 0x2b0   : > { %v1029_v51 = vadd.f32 %v1027_v50, %v1010_v40 }
 0x2b2   : > { %v1045_v35 = vpop.permute.xlu1 %1044  ;;  %v1043_v30 = vpop.permute.xlu0 %1042 }
 0x2b3   : > { %v1046_v63 = vsel %vm793_vm11, %v1043_v30, %v1045_v35 }
 0x2b4   : > { %v1048_v24 = vadd.f32 %v1046_v63, %v1029_v51 }
 0x2b6   : > { %v1064_v3 = vpop.permute.xlu1 %1063  ;;  %v1062_v34 = vpop.permute.xlu0 %1061 }
 0x2b7   : > { %v1065_v7 = vsel %vm814_vm9, %v1062_v34, %v1064_v3 }
 0x2b8   : > { %v1067_v12 = vadd.f32 %v1065_v7, %v1048_v24 }
 0x2ba   : > { %v1083_v22 = vpop.permute.xlu1 %1082  ;;  %v1081_v49 = vpop.permute.xlu0 %1080 }
 0x2bb   : > { %v1084_v25 = vsel %vm814_vm9, %v1081_v49, %v1083_v22 }
 0x2bc   : > { %v1086_v32 = vadd.f32 %v1084_v25, %v1067_v12 }
 0x2be   : > { %v1102_v52 = vpop.permute.xlu1 %1101  ;;  %v1100_v53 = vpop.permute.xlu0 %1099 }
 0x2bf   : > { %v1103_v55 = vsel %vm793_vm11, %v1100_v53, %v1102_v52 }
 0x2c0   : > { %v1105_v57 = vadd.f32 %v1103_v55, %v1086_v32 }
 0x2c2   : > { %v1121_v54 = vpop.permute.xlu1 %1120  ;;  %v1119_v31 = vpop.permute.xlu0 %1118 }
 0x2c3   : > { %v1122_v56 = vsel %vm793_vm11, %v1119_v31, %v1121_v54 }
 0x2c4   : > { %v1124_v27 = vadd.f32 %v1122_v56, %v1105_v57 }
 0x2c6   : > { %v1140_v20 = vpop.permute.xlu1 %1139  ;;  %v1138_v13 = vpop.permute.xlu0 %1137 }
 0x2c7   : > { %v1141_v60 = vsel %vm814_vm9, %v1138_v13, %v1140_v20 }
 0x2c8   : > { %v1143_v17 = vadd.f32 %v1141_v60, %v1124_v27 }
 0x2ca   : > { %v1159_v61 = vpop.permute.xlu1 %1158  ;;  %v1157_v62 = vpop.permute.xlu0 %1156 }
 0x2cb   : > { %v1160_v14 = vsel %vm814_vm9, %v1157_v62, %v1159_v61 }
 0x2cc   : > { %v1162_v11 = vadd.f32 %v1160_v14, %v1143_v17 }
 0x2ce   : > { %1163 = vst [vmem:[%s291_s13] sm:$0xff] %v1162_v11 }
 0x2cf PF: > { %s19_s23 = sadd.s32 1, %s1391_s23  }
 0x2d0   : > { %p16_p5 = scmp.ge.s32.totalorder %s19_s23, 4  }
 0x2d2   :  { %18 = sbr.rel (!%p16_p5) target bundleno = 6 (0x6), region = 89 }
 0x2d9   :  { %1183 = vsyncpa [#allocation4], 1 }
 0x2da   :  { %1185 = vsyncpa [#allocation4 + $0x1], 1 }
 0x2db   :  { %1186 = vsyncpa [#allocation6], 1 }

</bundles_post_ra>
